<compile_context>
chip_gen: v5e
topology: v5e:2x2
jax: 0.10.0
libtpu: 0.0.40
codegen_flags: <defaults>
</compile_context>

<pallas_src>
import functools

import jax
import jax.numpy as jnp
from jax.experimental import pallas as pl
from jax.experimental.pallas import tpu as pltpu

LN_EPS = 1e-5


def mha_block_kernel(x_ref,
                     wq_ref, wk_ref, wv_ref, bq_ref, bk_ref, bv_ref,
                     wo_ref, bo_ref,
                     w1_ref, b1_ref, w2_ref, b2_ref,
                     g1_ref, be1_ref, g2_ref, be2_ref,
                     o_ref, attn_scr, *, num_heads):
    bt, N, C = x_ref.shape
    rows = bt * N
    dh = C // num_heads
    f32 = jnp.float32

    x_in = x_ref[...]                        # (bt, N, C), compute dtype
    cdt = x_in.dtype
    exact = cdt == f32                       # strict path -> exact reciprocal
    x2 = x_in.reshape(rows, C)               # flatten batch block: big MXU M dim

    # ---- per-head projection + attention ----
    # Weights are pre-transposed and head-split on the host (wq_ref: (H,C,dh),
    # 1/sqrt(dh) folded into wq/bq), so there are no in-kernel transposes and
    # no sub-128 lane slices of a merged (rows, C) projection.
    # TODO(synk): key_padding_mask / full_attn_mask not plumbed (callers pass None).
    # TODO(synk): for num_heads >= ~8 or N >= ~1k move heads to a grid axis (or
    #             lax.fori_loop) and switch to flash-style KV tiling; the static
    #             Python loop does not bound live ranges of the score tiles.
    for h in range(num_heads):
        qh = (jnp.dot(x2, wq_ref[h], preferred_element_type=f32)
              + bq_ref[h]).astype(cdt).reshape(bt, N, dh)
        kh = (jnp.dot(x2, wk_ref[h], preferred_element_type=f32)
              + bk_ref[h]).astype(cdt).reshape(bt, N, dh)
        vh = (jnp.dot(x2, wv_ref[h], preferred_element_type=f32)
              + bv_ref[h]).astype(cdt).reshape(bt, N, dh)

        s = jnp.einsum('bnd,bpd->bnp', qh, kh,
                       preferred_element_type=f32)            # (bt, N, N) f32
        s = s - jnp.max(s, axis=-1, keepdims=True)
        e = jnp.exp(s)                                         # EUP, f32
        denom = jnp.sum(e, axis=-1, keepdims=True)
        inv = (1.0 / denom) if exact else pl.reciprocal(denom, approx=True)

        # Deferred softmax normalization: scale the (bt, N, dh) PV output
        # instead of the (bt, N, N) probabilities (N/dh less VPU work).
        oh = jnp.einsum('bnp,bpd->bnd', e.astype(cdt), vh,
                        preferred_element_type=f32)            # (bt, N, dh) f32
        oh = oh * inv

        # Merge heads into a lane-contiguous (rows, C) slab (lane-aligned when
        # dh % 128 == 0); the single K=C out-projection matmul below then runs
        # at full MXU contraction depth.
        attn_scr[:, h * dh:(h + 1) * dh] = oh.reshape(rows, dh).astype(cdt)

    # ---- out-projection: one full (rows,C)@(C,C) matmul ----
    attn = jnp.dot(attn_scr[...], wo_ref[...],
                   preferred_element_type=f32) + bo_ref[...]

    # ---- residual + LayerNorm 1 (f32 stats, robust (x-mu)^2 form) ----
    x1 = x2.astype(f32) + attn
    mu = jnp.mean(x1, axis=-1, keepdims=True)
    xc = x1 - mu
    var = jnp.mean(xc * xc, axis=-1, keepdims=True)
    y1 = xc * jax.lax.rsqrt(var + LN_EPS) * g1_ref[...] + be1_ref[...]

    # ---- MLP: linear1 -> relu -> linear2 (dropouts are identity) ----
    # TODO(synk): for C >= ~2048 stream w1/w2 over an 'arbitrary' K grid axis
    #             instead of holding them resident and materializing (rows,4C).
    h1 = jnp.dot(y1.astype(cdt), w1_ref[...],
                 preferred_element_type=f32) + b1_ref[...]
    h1 = jnp.maximum(h1, 0.0).astype(cdt)
    z = jnp.dot(h1, w2_ref[...], preferred_element_type=f32) + b2_ref[...]

    # ---- residual + LayerNorm 2 ----
    xo = y1 + z
    mu = jnp.mean(xo, axis=-1, keepdims=True)
    xc = xo - mu
    var = jnp.mean(xc * xc, axis=-1, keepdims=True)
    out = xc * jax.lax.rsqrt(var + LN_EPS) * g2_ref[...] + be2_ref[...]

    o_ref[...] = out.reshape(bt, N, C).astype(o_ref.dtype)


def _prep_params(params, num_heads, dtype):
    """Host-side one-time prep: transpose, head-split, fold attention scale."""
    (wq, wk, wv, bq, bk, bv, wo, bo, w1, b1, w2, b2, g1, be1, g2, be2) = params
    C = wq.shape[0]
    dh = C // num_heads
    scale = 1.0 / float(dh) ** 0.5
    f32 = jnp.float32

    def head_split_w(w, s=1.0):
        # nn.Linear does x @ W^T; transpose, then split the output dim per head.
        return jnp.asarray((w.T * s).reshape(C, num_heads, dh).transpose(1, 0, 2),
                           dtype)

    def head_split_b(b, s=1.0):
        return jnp.asarray((b.reshape(C) * s).reshape(num_heads, 1, dh), f32)

    return (head_split_w(wq, scale), head_split_w(wk), head_split_w(wv),
            head_split_b(bq, scale), head_split_b(bk), head_split_b(bv),
            jnp.asarray(wo.T, dtype), jnp.asarray(bo, f32),
            jnp.asarray(w1.T, dtype), jnp.asarray(b1, f32),
            jnp.asarray(w2.T, dtype), jnp.asarray(b2, f32),
            jnp.asarray(g1, f32), jnp.asarray(be1, f32),
            jnp.asarray(g2, f32), jnp.asarray(be2, f32))


def _vmem_capacity_bytes():
    """Per-generation VMEM capacity (128 MiB v5e/v6e, 64 MiB v7x)."""
    try:
        cap = getattr(pltpu.get_tpu_info(), "vmem_capacity_bytes", None)
        if cap:
            return int(cap)
    except Exception:
        pass
    return 64 * 1024 * 1024   # conservative fallback valid on all generations


def mha_block(q, params, num_heads, *, block_b=None, compute_dtype=None):
    """q: (B, N, C). params: PyTorch-layout weights (see init_params)."""
    B, N, C = q.shape
    assert C % num_heads == 0
    cdt = jnp.dtype(compute_dtype) if compute_dtype is not None else q.dtype
    kparams = _prep_params(params, num_heads, cdt)
    x = q.astype(cdt)

    vmem_cap = _vmem_capacity_bytes()
    wbytes = sum(int(p.size) * p.dtype.itemsize for p in kparams)

    def block_bytes(bt):
        rows = bt * N
        act = rows * C * 4                 # f32 activation slabs
        score = bt * N * N * 4             # one head's f32 score tile
        h1 = rows * 4 * C * 4              # MLP intermediate, f32
        return 5 * act + 2 * score + h1

    if block_b is None:
        # Chip-aware row target: 128-MiB parts (v5e/v6e) amortize per-step
        # overhead best with ~512 rows/step; 64-MiB v7x with ~256.
        rows_target = 512 if vmem_cap >= (96 << 20) else 256
        bt = max(1, min(B, max(1, rows_target // max(N, 1))))
        while B % bt:
            bt -= 1
        # Shrink until the per-step working set fits comfortably.
        while bt > 1 and wbytes + block_bytes(bt) > int(0.6 * vmem_cap):
            nb = bt - 1
            while B % nb:
                nb -= 1
            bt = nb
        # v7x has 2 TensorCores: prefer an even grid length when halving bt
        # still keeps the MXU M dim reasonably filled.
        if (B // bt) % 2 == 1 and bt % 2 == 0 and (bt // 2) * N >= 128:
            bt //= 2
    else:
        bt = block_b
    assert B % bt == 0
    grid = (B // bt,)

    kernel = functools.partial(mha_block_kernel, num_heads=num_heads)

    buffered_one = pl.Buffered(1) if hasattr(pl, "Buffered") else None

    def _const_spec(p):
        zeros = (0,) * p.ndim
        idx = lambda b, _z=zeros: _z
        if buffered_one is not None:
            # Constant index_map -> single-buffer resident weights (halves
            # their VMEM footprint vs. the default double-buffering).
            return pl.BlockSpec(p.shape, idx, pipeline_mode=buffered_one)
        return pl.BlockSpec(p.shape, idx)

    in_specs = [pl.BlockSpec((bt, N, C), lambda b: (b, 0, 0))]
    in_specs += [_const_spec(p) for p in kparams]

    # VMEM budget: single-buffered weights + per-step working set + margin,
    # capped at ~87% of this chip's physical VMEM.
    vmem_limit = int(min(max(32 << 20, wbytes + block_bytes(bt) + (8 << 20)),
                         int(0.875 * vmem_cap)))

    rows_total = B * N
    cost = pl.CostEstimate(
        flops=int(24 * rows_total * C * C + 4 * B * N * N * C),
        transcendentals=int(B * num_heads * N * N + 2 * rows_total),
        bytes_accessed=int(2 * rows_total * C * x.dtype.itemsize + wbytes))

    return pl.pallas_call(
        kernel,
        out_shape=jax.ShapeDtypeStruct((B, N, C), q.dtype),
        grid=grid,
        in_specs=in_specs,
        out_specs=pl.BlockSpec((bt, N, C), lambda b: (b, 0, 0)),
        scratch_shapes=[pltpu.VMEM((bt * N, C), cdt)],
        compiler_params=pltpu.CompilerParams(
            dimension_semantics=("parallel",),
            vmem_limit_bytes=vmem_limit),
        cost_estimate=cost,
    )(x, *kparams)


def mha_block_reference(q, params, num_heads):
    """Pure-JAX reference matching the PyTorch forward (eval mode, no masks)."""
    (wq, wk, wv, bq, bk, bv, wo, bo, w1, b1, w2, b2, g1, be1, g2, be2) = params
    B, N, C = q.shape
    dh = C // num_heads
    scale = 1.0 / (dh ** 0.5)

    qp = q @ wq.T + bq[0]
    kp = q @ wk.T + bk[0]
    vp = q @ wv.T + bv[0]

    def split(t):  # (B, N, C) -> (B, H, N, dh)
        return t.reshape(B, N, num_heads, dh).transpose(0, 2, 1, 3)

    qh, kh, vh = split(qp), split(kp), split(vp)
    s = jnp.einsum('bhnd,bhpd->bhnp', qh, kh) * scale
    p = jax.nn.softmax(s, axis=-1)
    o = jnp.einsum('bhnp,bhpd->bhnd', p, vh)
    o = o.transpose(0, 2, 1, 3).reshape(B, N, C)
    o = o @ wo.T + bo[0]

    x = q + o
    mu = x.mean(-1, keepdims=True)
    var = ((x - mu) ** 2).mean(-1, keepdims=True)
    x = (x - mu) * jax.lax.rsqrt(var + LN_EPS) * g1[0] + be1[0]

    y = jnp.maximum(x @ w1.T + b1[0], 0.0) @ w2.T + b2[0]
    x = x + y
    mu = x.mean(-1, keepdims=True)
    var = ((x - mu) ** 2).mean(-1, keepdims=True)
    x = (x - mu) * jax.lax.rsqrt(var + LN_EPS) * g2[0] + be2[0]
    return x


def init_params(key, hidden_size):
    C = hidden_size
    ks = jax.random.split(key, 8)
    std = 0.02
    wq = jax.random.normal(ks[0], (C, C), jnp.float32) * std
    wk = jax.random.normal(ks[1], (C, C), jnp.float32) * std
    wv = jax.random.normal(ks[2], (C, C), jnp.float32) * std
    wo = jax.random.normal(ks[3], (C, C), jnp.float32) * std
    w1 = jax.random.normal(ks[4], (4 * C, C), jnp.float32) * std
    w2 = jax.random.normal(ks[5], (C, 4 * C), jnp.float32) * std
    bq = jax.random.normal(ks[6], (1, C), jnp.float32) * std
    bk = jnp.zeros((1, C), jnp.float32)
    bv = jax.random.normal(ks[7], (1, C), jnp.float32) * std
    bo = jnp.zeros((1, C), jnp.float32)
    b1 = jnp.zeros((1, 4 * C), jnp.float32)
    b2 = jnp.zeros((1, C), jnp.float32)
    g1 = jnp.ones((1, C), jnp.float32)
    be1 = jnp.zeros((1, C), jnp.float32)
    g2 = jnp.ones((1, C), jnp.float32)
    be2 = jnp.zeros((1, C), jnp.float32)
    return (wq, wk, wv, bq, bk, bv, wo, bo, w1, b1, w2, b2, g1, be1, g2, be2)


if __name__ == "__main__":
    B, N, C, H = 2, 8, 32, 4   # batch, seq, hidden, heads (hidden % heads == 0)
    key = jax.random.PRNGKey(0)
    kx, kp = jax.random.split(key)
    q = jax.random.normal(kx, (B, N, C), jnp.float32)
    params = init_params(kp, C)

    ref = mha_block_reference(q, params, num_heads=H)

    # f32 compute path (strict tolerance vs. reference).
    out = jax.block_until_ready(mha_block(q, params, num_heads=H))
    assert out.shape == (B, N, C)
    assert jnp.allclose(out, ref, atol=1e-4, rtol=1e-4), \
        f"max abs err {jnp.max(jnp.abs(out - ref))}"

    # bf16 compute path (bf16 MXU operands, f32 accumulation / softmax / LN).
    out_bf16 = jax.block_until_ready(
        mha_block(q, params, num_heads=H, compute_dtype=jnp.bfloat16))
    assert out_bf16.shape == (B, N, C)
    assert jnp.allclose(out_bf16.astype(jnp.float32), ref, atol=2e-1, rtol=2e-1), \
        f"bf16 max abs err {jnp.max(jnp.abs(out_bf16.astype(jnp.float32) - ref))}"

    print("KERNEL_OK")
</pallas_src>

<mosaic_0001>
module attributes {stable_mosaic.version = 11 : i64} {
  func.func @mha_block_kernel(%arg0: i32, %arg1: memref<2x8x32xf32, #tpu.memory_space<vmem>>, %arg2: memref<4x32x8xf32, #tpu.memory_space<vmem>>, %arg3: memref<4x32x8xf32, #tpu.memory_space<vmem>>, %arg4: memref<4x32x8xf32, #tpu.memory_space<vmem>>, %arg5: memref<4x1x8xf32, #tpu.memory_space<vmem>>, %arg6: memref<4x1x8xf32, #tpu.memory_space<vmem>>, %arg7: memref<4x1x8xf32, #tpu.memory_space<vmem>>, %arg8: memref<32x32xf32, #tpu.memory_space<vmem>>, %arg9: memref<1x32xf32, #tpu.memory_space<vmem>>, %arg10: memref<32x128xf32, #tpu.memory_space<vmem>>, %arg11: memref<1x128xf32, #tpu.memory_space<vmem>>, %arg12: memref<128x32xf32, #tpu.memory_space<vmem>>, %arg13: memref<1x32xf32, #tpu.memory_space<vmem>>, %arg14: memref<1x32xf32, #tpu.memory_space<vmem>>, %arg15: memref<1x32xf32, #tpu.memory_space<vmem>>, %arg16: memref<1x32xf32, #tpu.memory_space<vmem>>, %arg17: memref<1x32xf32, #tpu.memory_space<vmem>>, %arg18: memref<2x8x32xf32, #tpu.memory_space<vmem>>, %arg19: memref<16x32xf32, #tpu.memory_space<vmem>>) attributes {dimension_semantics = [#tpu.dimension_semantics<parallel>], iteration_bounds = array<i64: 1>, scalar_prefetch = 0 : i64, scratch_operands = 1 : i64, tpu.core_type = #tpu.core_type<tc>, window_params = [{transform_indices = @transform_0, window_bounds = array<i64: 2, 8, 32>}, {pipeline_mode = #tpu.pipeline_mode<synchronous>, transform_indices = @transform_1, window_bounds = array<i64: 4, 32, 8>}, {pipeline_mode = #tpu.pipeline_mode<synchronous>, transform_indices = @transform_2, window_bounds = array<i64: 4, 32, 8>}, {pipeline_mode = #tpu.pipeline_mode<synchronous>, transform_indices = @transform_3, window_bounds = array<i64: 4, 32, 8>}, {pipeline_mode = #tpu.pipeline_mode<synchronous>, transform_indices = @transform_4, window_bounds = array<i64: 4, 1, 8>}, {pipeline_mode = #tpu.pipeline_mode<synchronous>, transform_indices = @transform_5, window_bounds = array<i64: 4, 1, 8>}, {pipeline_mode = #tpu.pipeline_mode<synchronous>, transform_indices = @transform_6, window_bounds = array<i64: 4, 1, 8>}, {pipeline_mode = #tpu.pipeline_mode<synchronous>, transform_indices = @transform_7, window_bounds = array<i64: 32, 32>}, {pipeline_mode = #tpu.pipeline_mode<synchronous>, transform_indices = @transform_8, window_bounds = array<i64: 1, 32>}, {pipeline_mode = #tpu.pipeline_mode<synchronous>, transform_indices = @transform_9, window_bounds = array<i64: 32, 128>}, {pipeline_mode = #tpu.pipeline_mode<synchronous>, transform_indices = @transform_10, window_bounds = array<i64: 1, 128>}, {pipeline_mode = #tpu.pipeline_mode<synchronous>, transform_indices = @transform_11, window_bounds = array<i64: 128, 32>}, {pipeline_mode = #tpu.pipeline_mode<synchronous>, transform_indices = @transform_12, window_bounds = array<i64: 1, 32>}, {pipeline_mode = #tpu.pipeline_mode<synchronous>, transform_indices = @transform_13, window_bounds = array<i64: 1, 32>}, {pipeline_mode = #tpu.pipeline_mode<synchronous>, transform_indices = @transform_14, window_bounds = array<i64: 1, 32>}, {pipeline_mode = #tpu.pipeline_mode<synchronous>, transform_indices = @transform_15, window_bounds = array<i64: 1, 32>}, {pipeline_mode = #tpu.pipeline_mode<synchronous>, transform_indices = @transform_16, window_bounds = array<i64: 1, 32>}, {transform_indices = @transform_17, window_bounds = array<i64: 2, 8, 32>}]} {
    %c0 = arith.constant 0 : index
    %c0_0 = arith.constant 0 : index
    %c0_1 = arith.constant 0 : index
    %0 = vector.load %arg1[%c0, %c0_0, %c0_1] : memref<2x8x32xf32, #tpu.memory_space<vmem>>, vector<2x8x32xf32>
    %1 = vector.shape_cast %0 : vector<2x8x32xf32> to vector<16x32xf32>
    %c0_2 = arith.constant 0 : index
    %c0_3 = arith.constant 0 : index
    %c0_4 = arith.constant 0 : index
    %2 = vector.load %arg2[%c0_2, %c0_3, %c0_4] : memref<4x32x8xf32, #tpu.memory_space<vmem>>, vector<1x32x8xf32>
    %3 = vector.shape_cast %2 : vector<1x32x8xf32> to vector<32x8xf32>
    %cst = arith.constant dense<0.000000e+00> : vector<16x8xf32>
    %4 = tpu.matmul %1, %3, %cst {dimension_numbers = #tpu.dot_dimension_numbers<[1], [0], [0], [1], [0, 0, 1, 1], [], []>} : vector<16x32xf32>, vector<32x8xf32>, vector<16x8xf32> -> vector<16x8xf32>
    %c0_5 = arith.constant 0 : index
    %c0_6 = arith.constant 0 : index
    %c0_7 = arith.constant 0 : index
    %5 = vector.load %arg5[%c0_5, %c0_6, %c0_7] : memref<4x1x8xf32, #tpu.memory_space<vmem>>, vector<1x1x8xf32>
    %6 = vector.shape_cast %5 : vector<1x1x8xf32> to vector<1x8xf32>
    %7 = vector.broadcast %6 : vector<1x8xf32> to vector<16x8xf32>
    %8 = arith.addf %4, %7 : vector<16x8xf32>
    %9 = vector.shape_cast %8 : vector<16x8xf32> to vector<2x8x8xf32>
    %c0_8 = arith.constant 0 : index
    %c0_9 = arith.constant 0 : index
    %c0_10 = arith.constant 0 : index
    %10 = vector.load %arg3[%c0_8, %c0_9, %c0_10] : memref<4x32x8xf32, #tpu.memory_space<vmem>>, vector<1x32x8xf32>
    %11 = vector.shape_cast %10 : vector<1x32x8xf32> to vector<32x8xf32>
    %cst_11 = arith.constant dense<0.000000e+00> : vector<16x8xf32>
    %12 = tpu.matmul %1, %11, %cst_11 {dimension_numbers = #tpu.dot_dimension_numbers<[1], [0], [0], [1], [0, 0, 1, 1], [], []>} : vector<16x32xf32>, vector<32x8xf32>, vector<16x8xf32> -> vector<16x8xf32>
    %c0_12 = arith.constant 0 : index
    %c0_13 = arith.constant 0 : index
    %c0_14 = arith.constant 0 : index
    %13 = vector.load %arg6[%c0_12, %c0_13, %c0_14] : memref<4x1x8xf32, #tpu.memory_space<vmem>>, vector<1x1x8xf32>
    %14 = vector.shape_cast %13 : vector<1x1x8xf32> to vector<1x8xf32>
    %15 = vector.broadcast %14 : vector<1x8xf32> to vector<16x8xf32>
    %16 = arith.addf %12, %15 : vector<16x8xf32>
    %17 = vector.shape_cast %16 : vector<16x8xf32> to vector<2x8x8xf32>
    %c0_15 = arith.constant 0 : index
    %c0_16 = arith.constant 0 : index
    %c0_17 = arith.constant 0 : index
    %18 = vector.load %arg4[%c0_15, %c0_16, %c0_17] : memref<4x32x8xf32, #tpu.memory_space<vmem>>, vector<1x32x8xf32>
    %19 = vector.shape_cast %18 : vector<1x32x8xf32> to vector<32x8xf32>
    %cst_18 = arith.constant dense<0.000000e+00> : vector<16x8xf32>
    %20 = tpu.matmul %1, %19, %cst_18 {dimension_numbers = #tpu.dot_dimension_numbers<[1], [0], [0], [1], [0, 0, 1, 1], [], []>} : vector<16x32xf32>, vector<32x8xf32>, vector<16x8xf32> -> vector<16x8xf32>
    %c0_19 = arith.constant 0 : index
    %c0_20 = arith.constant 0 : index
    %c0_21 = arith.constant 0 : index
    %21 = vector.load %arg7[%c0_19, %c0_20, %c0_21] : memref<4x1x8xf32, #tpu.memory_space<vmem>>, vector<1x1x8xf32>
    %22 = vector.shape_cast %21 : vector<1x1x8xf32> to vector<1x8xf32>
    %23 = vector.broadcast %22 : vector<1x8xf32> to vector<16x8xf32>
    %24 = arith.addf %20, %23 : vector<16x8xf32>
    %25 = vector.shape_cast %24 : vector<16x8xf32> to vector<2x8x8xf32>
    "tpu.trace_start"() <{level = 10 : i32, message = "bnd,bpd->bnp"}> : () -> ()
    %cst_22 = arith.constant dense<0.000000e+00> : vector<2x8x8xf32>
    %26 = tpu.matmul %9, %17, %cst_22 {dimension_numbers = #tpu.dot_dimension_numbers<[2], [2], [1], [1], [0, 0, 0, 1, 1, 1], [0], [0]>} : vector<2x8x8xf32>, vector<2x8x8xf32>, vector<2x8x8xf32> -> vector<2x8x8xf32>
    "tpu.trace_stop"() : () -> ()
    %cst_23 = arith.constant dense<0xFF800000> : vector<2x8xf32>
    %27 = vector.multi_reduction <maximumf>, %26, %cst_23 [2] : vector<2x8x8xf32> to vector<2x8xf32>
    %28 = vector.shape_cast %27 : vector<2x8xf32> to vector<2x8x1xf32>
    %29 = vector.broadcast %28 : vector<2x8x1xf32> to vector<2x8x8xf32>
    %30 = arith.subf %26, %29 : vector<2x8x8xf32>
    %31 = math.exp %30 : vector<2x8x8xf32>
    %cst_24 = arith.constant dense<0.000000e+00> : vector<2x8xf32>
    %32 = vector.multi_reduction <add>, %31, %cst_24 [2] : vector<2x8x8xf32> to vector<2x8xf32>
    %33 = vector.shape_cast %32 : vector<2x8xf32> to vector<2x8x1xf32>
    %cst_25 = arith.constant 1.000000e+00 : f32
    %34 = vector.broadcast %cst_25 : f32 to vector<2x8x1xf32>
    %35 = arith.divf %34, %33 : vector<2x8x1xf32>
    "tpu.trace_start"() <{level = 10 : i32, message = "bnp,bpd->bnd"}> : () -> ()
    %cst_26 = arith.constant dense<0.000000e+00> : vector<2x8x8xf32>
    %36 = tpu.matmul %31, %25, %cst_26 {dimension_numbers = #tpu.dot_dimension_numbers<[2], [1], [1], [2], [0, 0, 0, 1, 1, 2], [0], [0]>} : vector<2x8x8xf32>, vector<2x8x8xf32>, vector<2x8x8xf32> -> vector<2x8x8xf32>
    "tpu.trace_stop"() : () -> ()
    %37 = vector.broadcast %35 : vector<2x8x1xf32> to vector<2x8x8xf32>
    %38 = arith.mulf %36, %37 : vector<2x8x8xf32>
    %39 = vector.shape_cast %38 : vector<2x8x8xf32> to vector<16x8xf32>
    %c0_27 = arith.constant 0 : index
    %c0_28 = arith.constant 0 : index
    %40 = vector.load %arg19[%c0_27, %c0_28] : memref<16x32xf32, #tpu.memory_space<vmem>>, vector<16x8xf32>
    tpu.vector_store %arg19[%c0_27, %c0_28], %39 {strides = array<i32>} : memref<16x32xf32, #tpu.memory_space<vmem>>, vector<16x8xf32>,
    %c1 = arith.constant 1 : index
    %c0_29 = arith.constant 0 : index
    %c0_30 = arith.constant 0 : index
    %41 = vector.load %arg2[%c1, %c0_29, %c0_30] : memref<4x32x8xf32, #tpu.memory_space<vmem>>, vector<1x32x8xf32>
    %42 = vector.shape_cast %41 : vector<1x32x8xf32> to vector<32x8xf32>
    %cst_31 = arith.constant dense<0.000000e+00> : vector<16x8xf32>
    %43 = tpu.matmul %1, %42, %cst_31 {dimension_numbers = #tpu.dot_dimension_numbers<[1], [0], [0], [1], [0, 0, 1, 1], [], []>} : vector<16x32xf32>, vector<32x8xf32>, vector<16x8xf32> -> vector<16x8xf32>
    %c1_32 = arith.constant 1 : index
    %c0_33 = arith.constant 0 : index
    %c0_34 = arith.constant 0 : index
    %44 = vector.load %arg5[%c1_32, %c0_33, %c0_34] : memref<4x1x8xf32, #tpu.memory_space<vmem>>, vector<1x1x8xf32>
    %45 = vector.shape_cast %44 : vector<1x1x8xf32> to vector<1x8xf32>
    %46 = vector.broadcast %45 : vector<1x8xf32> to vector<16x8xf32>
    %47 = arith.addf %43, %46 : vector<16x8xf32>
    %48 = vector.shape_cast %47 : vector<16x8xf32> to vector<2x8x8xf32>
    %c1_35 = arith.constant 1 : index
    %c0_36 = arith.constant 0 : index
    %c0_37 = arith.constant 0 : index
    %49 = vector.load %arg3[%c1_35, %c0_36, %c0_37] : memref<4x32x8xf32, #tpu.memory_space<vmem>>, vector<1x32x8xf32>
    %50 = vector.shape_cast %49 : vector<1x32x8xf32> to vector<32x8xf32>
    %cst_38 = arith.constant dense<0.000000e+00> : vector<16x8xf32>
    %51 = tpu.matmul %1, %50, %cst_38 {dimension_numbers = #tpu.dot_dimension_numbers<[1], [0], [0], [1], [0, 0, 1, 1], [], []>} : vector<16x32xf32>, vector<32x8xf32>, vector<16x8xf32> -> vector<16x8xf32>
    %c1_39 = arith.constant 1 : index
    %c0_40 = arith.constant 0 : index
    %c0_41 = arith.constant 0 : index
    %52 = vector.load %arg6[%c1_39, %c0_40, %c0_41] : memref<4x1x8xf32, #tpu.memory_space<vmem>>, vector<1x1x8xf32>
    %53 = vector.shape_cast %52 : vector<1x1x8xf32> to vector<1x8xf32>
    %54 = vector.broadcast %53 : vector<1x8xf32> to vector<16x8xf32>
    %55 = arith.addf %51, %54 : vector<16x8xf32>
    %56 = vector.shape_cast %55 : vector<16x8xf32> to vector<2x8x8xf32>
    %c1_42 = arith.constant 1 : index
    %c0_43 = arith.constant 0 : index
    %c0_44 = arith.constant 0 : index
    %57 = vector.load %arg4[%c1_42, %c0_43, %c0_44] : memref<4x32x8xf32, #tpu.memory_space<vmem>>, vector<1x32x8xf32>
    %58 = vector.shape_cast %57 : vector<1x32x8xf32> to vector<32x8xf32>
    %cst_45 = arith.constant dense<0.000000e+00> : vector<16x8xf32>
    %59 = tpu.matmul %1, %58, %cst_45 {dimension_numbers = #tpu.dot_dimension_numbers<[1], [0], [0], [1], [0, 0, 1, 1], [], []>} : vector<16x32xf32>, vector<32x8xf32>, vector<16x8xf32> -> vector<16x8xf32>
    %c1_46 = arith.constant 1 : index
    %c0_47 = arith.constant 0 : index
    %c0_48 = arith.constant 0 : index
    %60 = vector.load %arg7[%c1_46, %c0_47, %c0_48] : memref<4x1x8xf32, #tpu.memory_space<vmem>>, vector<1x1x8xf32>
    %61 = vector.shape_cast %60 : vector<1x1x8xf32> to vector<1x8xf32>
    %62 = vector.broadcast %61 : vector<1x8xf32> to vector<16x8xf32>
    %63 = arith.addf %59, %62 : vector<16x8xf32>
    %64 = vector.shape_cast %63 : vector<16x8xf32> to vector<2x8x8xf32>
    "tpu.trace_start"() <{level = 10 : i32, message = "bnd,bpd->bnp"}> : () -> ()
    %cst_49 = arith.constant dense<0.000000e+00> : vector<2x8x8xf32>
    %65 = tpu.matmul %48, %56, %cst_49 {dimension_numbers = #tpu.dot_dimension_numbers<[2], [2], [1], [1], [0, 0, 0, 1, 1, 1], [0], [0]>} : vector<2x8x8xf32>, vector<2x8x8xf32>, vector<2x8x8xf32> -> vector<2x8x8xf32>
    "tpu.trace_stop"() : () -> ()
    %cst_50 = arith.constant dense<0xFF800000> : vector<2x8xf32>
    %66 = vector.multi_reduction <maximumf>, %65, %cst_50 [2] : vector<2x8x8xf32> to vector<2x8xf32>
    %67 = vector.shape_cast %66 : vector<2x8xf32> to vector<2x8x1xf32>
    %68 = vector.broadcast %67 : vector<2x8x1xf32> to vector<2x8x8xf32>
    %69 = arith.subf %65, %68 : vector<2x8x8xf32>
    %70 = math.exp %69 : vector<2x8x8xf32>
    %cst_51 = arith.constant dense<0.000000e+00> : vector<2x8xf32>
    %71 = vector.multi_reduction <add>, %70, %cst_51 [2] : vector<2x8x8xf32> to vector<2x8xf32>
    %72 = vector.shape_cast %71 : vector<2x8xf32> to vector<2x8x1xf32>
    %cst_52 = arith.constant 1.000000e+00 : f32
    %73 = vector.broadcast %cst_52 : f32 to vector<2x8x1xf32>
    %74 = arith.divf %73, %72 : vector<2x8x1xf32>
    "tpu.trace_start"() <{level = 10 : i32, message = "bnp,bpd->bnd"}> : () -> ()
    %cst_53 = arith.constant dense<0.000000e+00> : vector<2x8x8xf32>
    %75 = tpu.matmul %70, %64, %cst_53 {dimension_numbers = #tpu.dot_dimension_numbers<[2], [1], [1], [2], [0, 0, 0, 1, 1, 2], [0], [0]>} : vector<2x8x8xf32>, vector<2x8x8xf32>, vector<2x8x8xf32> -> vector<2x8x8xf32>
    "tpu.trace_stop"() : () -> ()
    %76 = vector.broadcast %74 : vector<2x8x1xf32> to vector<2x8x8xf32>
    %77 = arith.mulf %75, %76 : vector<2x8x8xf32>
    %78 = vector.shape_cast %77 : vector<2x8x8xf32> to vector<16x8xf32>
    %c0_54 = arith.constant 0 : index
    %c8 = arith.constant 8 : index
    %79 = vector.load %arg19[%c0_54, %c8] : memref<16x32xf32, #tpu.memory_space<vmem>>, vector<16x8xf32>
    tpu.vector_store %arg19[%c0_54, %c8], %78 {strides = array<i32>} : memref<16x32xf32, #tpu.memory_space<vmem>>, vector<16x8xf32>,
    %c2 = arith.constant 2 : index
    %c0_55 = arith.constant 0 : index
    %c0_56 = arith.constant 0 : index
    %80 = vector.load %arg2[%c2, %c0_55, %c0_56] : memref<4x32x8xf32, #tpu.memory_space<vmem>>, vector<1x32x8xf32>
    %81 = vector.shape_cast %80 : vector<1x32x8xf32> to vector<32x8xf32>
    %cst_57 = arith.constant dense<0.000000e+00> : vector<16x8xf32>
    %82 = tpu.matmul %1, %81, %cst_57 {dimension_numbers = #tpu.dot_dimension_numbers<[1], [0], [0], [1], [0, 0, 1, 1], [], []>} : vector<16x32xf32>, vector<32x8xf32>, vector<16x8xf32> -> vector<16x8xf32>
    %c2_58 = arith.constant 2 : index
    %c0_59 = arith.constant 0 : index
    %c0_60 = arith.constant 0 : index
    %83 = vector.load %arg5[%c2_58, %c0_59, %c0_60] : memref<4x1x8xf32, #tpu.memory_space<vmem>>, vector<1x1x8xf32>
    %84 = vector.shape_cast %83 : vector<1x1x8xf32> to vector<1x8xf32>
    %85 = vector.broadcast %84 : vector<1x8xf32> to vector<16x8xf32>
    %86 = arith.addf %82, %85 : vector<16x8xf32>
    %87 = vector.shape_cast %86 : vector<16x8xf32> to vector<2x8x8xf32>
    %c2_61 = arith.constant 2 : index
    %c0_62 = arith.constant 0 : index
    %c0_63 = arith.constant 0 : index
    %88 = vector.load %arg3[%c2_61, %c0_62, %c0_63] : memref<4x32x8xf32, #tpu.memory_space<vmem>>, vector<1x32x8xf32>
    %89 = vector.shape_cast %88 : vector<1x32x8xf32> to vector<32x8xf32>
    %cst_64 = arith.constant dense<0.000000e+00> : vector<16x8xf32>
    %90 = tpu.matmul %1, %89, %cst_64 {dimension_numbers = #tpu.dot_dimension_numbers<[1], [0], [0], [1], [0, 0, 1, 1], [], []>} : vector<16x32xf32>, vector<32x8xf32>, vector<16x8xf32> -> vector<16x8xf32>
    %c2_65 = arith.constant 2 : index
    %c0_66 = arith.constant 0 : index
    %c0_67 = arith.constant 0 : index
    %91 = vector.load %arg6[%c2_65, %c0_66, %c0_67] : memref<4x1x8xf32, #tpu.memory_space<vmem>>, vector<1x1x8xf32>
    %92 = vector.shape_cast %91 : vector<1x1x8xf32> to vector<1x8xf32>
    %93 = vector.broadcast %92 : vector<1x8xf32> to vector<16x8xf32>
    %94 = arith.addf %90, %93 : vector<16x8xf32>
    %95 = vector.shape_cast %94 : vector<16x8xf32> to vector<2x8x8xf32>
    %c2_68 = arith.constant 2 : index
    %c0_69 = arith.constant 0 : index
    %c0_70 = arith.constant 0 : index
    %96 = vector.load %arg4[%c2_68, %c0_69, %c0_70] : memref<4x32x8xf32, #tpu.memory_space<vmem>>, vector<1x32x8xf32>
    %97 = vector.shape_cast %96 : vector<1x32x8xf32> to vector<32x8xf32>
    %cst_71 = arith.constant dense<0.000000e+00> : vector<16x8xf32>
    %98 = tpu.matmul %1, %97, %cst_71 {dimension_numbers = #tpu.dot_dimension_numbers<[1], [0], [0], [1], [0, 0, 1, 1], [], []>} : vector<16x32xf32>, vector<32x8xf32>, vector<16x8xf32> -> vector<16x8xf32>
    %c2_72 = arith.constant 2 : index
    %c0_73 = arith.constant 0 : index
    %c0_74 = arith.constant 0 : index
    %99 = vector.load %arg7[%c2_72, %c0_73, %c0_74] : memref<4x1x8xf32, #tpu.memory_space<vmem>>, vector<1x1x8xf32>
    %100 = vector.shape_cast %99 : vector<1x1x8xf32> to vector<1x8xf32>
    %101 = vector.broadcast %100 : vector<1x8xf32> to vector<16x8xf32>
    %102 = arith.addf %98, %101 : vector<16x8xf32>
    %103 = vector.shape_cast %102 : vector<16x8xf32> to vector<2x8x8xf32>
    "tpu.trace_start"() <{level = 10 : i32, message = "bnd,bpd->bnp"}> : () -> ()
    %cst_75 = arith.constant dense<0.000000e+00> : vector<2x8x8xf32>
    %104 = tpu.matmul %87, %95, %cst_75 {dimension_numbers = #tpu.dot_dimension_numbers<[2], [2], [1], [1], [0, 0, 0, 1, 1, 1], [0], [0]>} : vector<2x8x8xf32>, vector<2x8x8xf32>, vector<2x8x8xf32> -> vector<2x8x8xf32>
    "tpu.trace_stop"() : () -> ()
    %cst_76 = arith.constant dense<0xFF800000> : vector<2x8xf32>
    %105 = vector.multi_reduction <maximumf>, %104, %cst_76 [2] : vector<2x8x8xf32> to vector<2x8xf32>
    %106 = vector.shape_cast %105 : vector<2x8xf32> to vector<2x8x1xf32>
    %107 = vector.broadcast %106 : vector<2x8x1xf32> to vector<2x8x8xf32>
    %108 = arith.subf %104, %107 : vector<2x8x8xf32>
    %109 = math.exp %108 : vector<2x8x8xf32>
    %cst_77 = arith.constant dense<0.000000e+00> : vector<2x8xf32>
    %110 = vector.multi_reduction <add>, %109, %cst_77 [2] : vector<2x8x8xf32> to vector<2x8xf32>
    %111 = vector.shape_cast %110 : vector<2x8xf32> to vector<2x8x1xf32>
    %cst_78 = arith.constant 1.000000e+00 : f32
    %112 = vector.broadcast %cst_78 : f32 to vector<2x8x1xf32>
    %113 = arith.divf %112, %111 : vector<2x8x1xf32>
    "tpu.trace_start"() <{level = 10 : i32, message = "bnp,bpd->bnd"}> : () -> ()
    %cst_79 = arith.constant dense<0.000000e+00> : vector<2x8x8xf32>
    %114 = tpu.matmul %109, %103, %cst_79 {dimension_numbers = #tpu.dot_dimension_numbers<[2], [1], [1], [2], [0, 0, 0, 1, 1, 2], [0], [0]>} : vector<2x8x8xf32>, vector<2x8x8xf32>, vector<2x8x8xf32> -> vector<2x8x8xf32>
    "tpu.trace_stop"() : () -> ()
    %115 = vector.broadcast %113 : vector<2x8x1xf32> to vector<2x8x8xf32>
    %116 = arith.mulf %114, %115 : vector<2x8x8xf32>
    %117 = vector.shape_cast %116 : vector<2x8x8xf32> to vector<16x8xf32>
    %c0_80 = arith.constant 0 : index
    %c16 = arith.constant 16 : index
    %118 = vector.load %arg19[%c0_80, %c16] : memref<16x32xf32, #tpu.memory_space<vmem>>, vector<16x8xf32>
    tpu.vector_store %arg19[%c0_80, %c16], %117 {strides = array<i32>} : memref<16x32xf32, #tpu.memory_space<vmem>>, vector<16x8xf32>,
    %c3 = arith.constant 3 : index
    %c0_81 = arith.constant 0 : index
    %c0_82 = arith.constant 0 : index
    %119 = vector.load %arg2[%c3, %c0_81, %c0_82] : memref<4x32x8xf32, #tpu.memory_space<vmem>>, vector<1x32x8xf32>
    %120 = vector.shape_cast %119 : vector<1x32x8xf32> to vector<32x8xf32>
    %cst_83 = arith.constant dense<0.000000e+00> : vector<16x8xf32>
    %121 = tpu.matmul %1, %120, %cst_83 {dimension_numbers = #tpu.dot_dimension_numbers<[1], [0], [0], [1], [0, 0, 1, 1], [], []>} : vector<16x32xf32>, vector<32x8xf32>, vector<16x8xf32> -> vector<16x8xf32>
    %c3_84 = arith.constant 3 : index
    %c0_85 = arith.constant 0 : index
    %c0_86 = arith.constant 0 : index
    %122 = vector.load %arg5[%c3_84, %c0_85, %c0_86] : memref<4x1x8xf32, #tpu.memory_space<vmem>>, vector<1x1x8xf32>
    %123 = vector.shape_cast %122 : vector<1x1x8xf32> to vector<1x8xf32>
    %124 = vector.broadcast %123 : vector<1x8xf32> to vector<16x8xf32>
    %125 = arith.addf %121, %124 : vector<16x8xf32>
    %126 = vector.shape_cast %125 : vector<16x8xf32> to vector<2x8x8xf32>
    %c3_87 = arith.constant 3 : index
    %c0_88 = arith.constant 0 : index
    %c0_89 = arith.constant 0 : index
    %127 = vector.load %arg3[%c3_87, %c0_88, %c0_89] : memref<4x32x8xf32, #tpu.memory_space<vmem>>, vector<1x32x8xf32>
    %128 = vector.shape_cast %127 : vector<1x32x8xf32> to vector<32x8xf32>
    %cst_90 = arith.constant dense<0.000000e+00> : vector<16x8xf32>
    %129 = tpu.matmul %1, %128, %cst_90 {dimension_numbers = #tpu.dot_dimension_numbers<[1], [0], [0], [1], [0, 0, 1, 1], [], []>} : vector<16x32xf32>, vector<32x8xf32>, vector<16x8xf32> -> vector<16x8xf32>
    %c3_91 = arith.constant 3 : index
    %c0_92 = arith.constant 0 : index
    %c0_93 = arith.constant 0 : index
    %130 = vector.load %arg6[%c3_91, %c0_92, %c0_93] : memref<4x1x8xf32, #tpu.memory_space<vmem>>, vector<1x1x8xf32>
    %131 = vector.shape_cast %130 : vector<1x1x8xf32> to vector<1x8xf32>
    %132 = vector.broadcast %131 : vector<1x8xf32> to vector<16x8xf32>
    %133 = arith.addf %129, %132 : vector<16x8xf32>
    %134 = vector.shape_cast %133 : vector<16x8xf32> to vector<2x8x8xf32>
    %c3_94 = arith.constant 3 : index
    %c0_95 = arith.constant 0 : index
    %c0_96 = arith.constant 0 : index
    %135 = vector.load %arg4[%c3_94, %c0_95, %c0_96] : memref<4x32x8xf32, #tpu.memory_space<vmem>>, vector<1x32x8xf32>
    %136 = vector.shape_cast %135 : vector<1x32x8xf32> to vector<32x8xf32>
    %cst_97 = arith.constant dense<0.000000e+00> : vector<16x8xf32>
    %137 = tpu.matmul %1, %136, %cst_97 {dimension_numbers = #tpu.dot_dimension_numbers<[1], [0], [0], [1], [0, 0, 1, 1], [], []>} : vector<16x32xf32>, vector<32x8xf32>, vector<16x8xf32> -> vector<16x8xf32>
    %c3_98 = arith.constant 3 : index
    %c0_99 = arith.constant 0 : index
    %c0_100 = arith.constant 0 : index
    %138 = vector.load %arg7[%c3_98, %c0_99, %c0_100] : memref<4x1x8xf32, #tpu.memory_space<vmem>>, vector<1x1x8xf32>
    %139 = vector.shape_cast %138 : vector<1x1x8xf32> to vector<1x8xf32>
    %140 = vector.broadcast %139 : vector<1x8xf32> to vector<16x8xf32>
    %141 = arith.addf %137, %140 : vector<16x8xf32>
    %142 = vector.shape_cast %141 : vector<16x8xf32> to vector<2x8x8xf32>
    "tpu.trace_start"() <{level = 10 : i32, message = "bnd,bpd->bnp"}> : () -> ()
    %cst_101 = arith.constant dense<0.000000e+00> : vector<2x8x8xf32>
    %143 = tpu.matmul %126, %134, %cst_101 {dimension_numbers = #tpu.dot_dimension_numbers<[2], [2], [1], [1], [0, 0, 0, 1, 1, 1], [0], [0]>} : vector<2x8x8xf32>, vector<2x8x8xf32>, vector<2x8x8xf32> -> vector<2x8x8xf32>
    "tpu.trace_stop"() : () -> ()
    %cst_102 = arith.constant dense<0xFF800000> : vector<2x8xf32>
    %144 = vector.multi_reduction <maximumf>, %143, %cst_102 [2] : vector<2x8x8xf32> to vector<2x8xf32>
    %145 = vector.shape_cast %144 : vector<2x8xf32> to vector<2x8x1xf32>
    %146 = vector.broadcast %145 : vector<2x8x1xf32> to vector<2x8x8xf32>
    %147 = arith.subf %143, %146 : vector<2x8x8xf32>
    %148 = math.exp %147 : vector<2x8x8xf32>
    %cst_103 = arith.constant dense<0.000000e+00> : vector<2x8xf32>
    %149 = vector.multi_reduction <add>, %148, %cst_103 [2] : vector<2x8x8xf32> to vector<2x8xf32>
    %150 = vector.shape_cast %149 : vector<2x8xf32> to vector<2x8x1xf32>
    %cst_104 = arith.constant 1.000000e+00 : f32
    %151 = vector.broadcast %cst_104 : f32 to vector<2x8x1xf32>
    %152 = arith.divf %151, %150 : vector<2x8x1xf32>
    "tpu.trace_start"() <{level = 10 : i32, message = "bnp,bpd->bnd"}> : () -> ()
    %cst_105 = arith.constant dense<0.000000e+00> : vector<2x8x8xf32>
    %153 = tpu.matmul %148, %142, %cst_105 {dimension_numbers = #tpu.dot_dimension_numbers<[2], [1], [1], [2], [0, 0, 0, 1, 1, 2], [0], [0]>} : vector<2x8x8xf32>, vector<2x8x8xf32>, vector<2x8x8xf32> -> vector<2x8x8xf32>
    "tpu.trace_stop"() : () -> ()
    %154 = vector.broadcast %152 : vector<2x8x1xf32> to vector<2x8x8xf32>
    %155 = arith.mulf %153, %154 : vector<2x8x8xf32>
    %156 = vector.shape_cast %155 : vector<2x8x8xf32> to vector<16x8xf32>
    %c0_106 = arith.constant 0 : index
    %c24 = arith.constant 24 : index
    %157 = vector.load %arg19[%c0_106, %c24] : memref<16x32xf32, #tpu.memory_space<vmem>>, vector<16x8xf32>
    tpu.vector_store %arg19[%c0_106, %c24], %156 {strides = array<i32>} : memref<16x32xf32, #tpu.memory_space<vmem>>, vector<16x8xf32>,
    %c0_107 = arith.constant 0 : index
    %c0_108 = arith.constant 0 : index
    %158 = vector.load %arg19[%c0_107, %c0_108] : memref<16x32xf32, #tpu.memory_space<vmem>>, vector<16x32xf32>
    %c0_109 = arith.constant 0 : index
    %c0_110 = arith.constant 0 : index
    %159 = vector.load %arg8[%c0_109, %c0_110] : memref<32x32xf32, #tpu.memory_space<vmem>>, vector<32x32xf32>
    %cst_111 = arith.constant dense<0.000000e+00> : vector<16x32xf32>
    %160 = tpu.matmul %158, %159, %cst_111 {dimension_numbers = #tpu.dot_dimension_numbers<[1], [0], [0], [1], [0, 0, 1, 1], [], []>} : vector<16x32xf32>, vector<32x32xf32>, vector<16x32xf32> -> vector<16x32xf32>
    %c0_112 = arith.constant 0 : index
    %c0_113 = arith.constant 0 : index
    %161 = vector.load %arg9[%c0_112, %c0_113] : memref<1x32xf32, #tpu.memory_space<vmem>>, vector<1x32xf32>
    %162 = vector.broadcast %161 : vector<1x32xf32> to vector<16x32xf32>
    %163 = arith.addf %160, %162 : vector<16x32xf32>
    %164 = arith.addf %1, %163 : vector<16x32xf32>
    %cst_114 = arith.constant dense<0.000000e+00> : vector<16xf32>
    %165 = vector.multi_reduction <add>, %164, %cst_114 [1] : vector<16x32xf32> to vector<16xf32>
    %166 = vector.shape_cast %165 : vector<16xf32> to vector<16x1xf32>
    %cst_115 = arith.constant 3.200000e+01 : f32
    %167 = vector.broadcast %cst_115 : f32 to vector<16x1xf32>
    %168 = arith.divf %166, %167 : vector<16x1xf32>
    %169 = vector.broadcast %168 : vector<16x1xf32> to vector<16x32xf32>
    %170 = arith.subf %164, %169 : vector<16x32xf32>
    %171 = arith.mulf %170, %170 : vector<16x32xf32>
    %cst_116 = arith.constant dense<0.000000e+00> : vector<16xf32>
    %172 = vector.multi_reduction <add>, %171, %cst_116 [1] : vector<16x32xf32> to vector<16xf32>
    %173 = vector.shape_cast %172 : vector<16xf32> to vector<16x1xf32>
    %cst_117 = arith.constant 3.200000e+01 : f32
    %174 = vector.broadcast %cst_117 : f32 to vector<16x1xf32>
    %175 = arith.divf %173, %174 : vector<16x1xf32>
    %cst_118 = arith.constant 9.99999974E-6 : f32
    %176 = vector.broadcast %cst_118 : f32 to vector<16x1xf32>
    %177 = arith.addf %175, %176 : vector<16x1xf32>
    %178 = math.rsqrt %177 : vector<16x1xf32>
    %179 = vector.broadcast %178 : vector<16x1xf32> to vector<16x32xf32>
    %180 = arith.mulf %170, %179 : vector<16x32xf32>
    %c0_119 = arith.constant 0 : index
    %c0_120 = arith.constant 0 : index
    %181 = vector.load %arg14[%c0_119, %c0_120] : memref<1x32xf32, #tpu.memory_space<vmem>>, vector<1x32xf32>
    %182 = vector.broadcast %181 : vector<1x32xf32> to vector<16x32xf32>
    %183 = arith.mulf %180, %182 : vector<16x32xf32>
    %c0_121 = arith.constant 0 : index
    %c0_122 = arith.constant 0 : index
    %184 = vector.load %arg15[%c0_121, %c0_122] : memref<1x32xf32, #tpu.memory_space<vmem>>, vector<1x32xf32>
    %185 = vector.broadcast %184 : vector<1x32xf32> to vector<16x32xf32>
    %186 = arith.addf %183, %185 : vector<16x32xf32>
    %c0_123 = arith.constant 0 : index
    %c0_124 = arith.constant 0 : index
    %187 = vector.load %arg10[%c0_123, %c0_124] : memref<32x128xf32, #tpu.memory_space<vmem>>, vector<32x128xf32>
    %cst_125 = arith.constant dense<0.000000e+00> : vector<16x128xf32>
    %188 = tpu.matmul %186, %187, %cst_125 {dimension_numbers = #tpu.dot_dimension_numbers<[1], [0], [0], [1], [0, 0, 1, 1], [], []>} : vector<16x32xf32>, vector<32x128xf32>, vector<16x128xf32> -> vector<16x128xf32>
    %c0_126 = arith.constant 0 : index
    %c0_127 = arith.constant 0 : index
    %189 = vector.load %arg11[%c0_126, %c0_127] : memref<1x128xf32, #tpu.memory_space<vmem>>, vector<1x128xf32>
    %190 = vector.broadcast %189 : vector<1x128xf32> to vector<16x128xf32>
    %191 = arith.addf %188, %190 : vector<16x128xf32>
    %cst_128 = arith.constant 0.000000e+00 : f32
    %192 = vector.broadcast %cst_128 : f32 to vector<16x128xf32>
    %193 = arith.maximumf %191, %192 : vector<16x128xf32>
    %c0_129 = arith.constant 0 : index
    %c0_130 = arith.constant 0 : index
    %194 = vector.load %arg12[%c0_129, %c0_130] : memref<128x32xf32, #tpu.memory_space<vmem>>, vector<128x32xf32>
    %cst_131 = arith.constant dense<0.000000e+00> : vector<16x32xf32>
    %195 = tpu.matmul %193, %194, %cst_131 {dimension_numbers = #tpu.dot_dimension_numbers<[1], [0], [0], [1], [0, 0, 1, 1], [], []>} : vector<16x128xf32>, vector<128x32xf32>, vector<16x32xf32> -> vector<16x32xf32>
    %c0_132 = arith.constant 0 : index
    %c0_133 = arith.constant 0 : index
    %196 = vector.load %arg13[%c0_132, %c0_133] : memref<1x32xf32, #tpu.memory_space<vmem>>, vector<1x32xf32>
    %197 = vector.broadcast %196 : vector<1x32xf32> to vector<16x32xf32>
    %198 = arith.addf %195, %197 : vector<16x32xf32>
    %199 = arith.addf %186, %198 : vector<16x32xf32>
    %cst_134 = arith.constant dense<0.000000e+00> : vector<16xf32>
    %200 = vector.multi_reduction <add>, %199, %cst_134 [1] : vector<16x32xf32> to vector<16xf32>
    %201 = vector.shape_cast %200 : vector<16xf32> to vector<16x1xf32>
    %cst_135 = arith.constant 3.200000e+01 : f32
    %202 = vector.broadcast %cst_135 : f32 to vector<16x1xf32>
    %203 = arith.divf %201, %202 : vector<16x1xf32>
    %204 = vector.broadcast %203 : vector<16x1xf32> to vector<16x32xf32>
    %205 = arith.subf %199, %204 : vector<16x32xf32>
    %206 = arith.mulf %205, %205 : vector<16x32xf32>
    %cst_136 = arith.constant dense<0.000000e+00> : vector<16xf32>
    %207 = vector.multi_reduction <add>, %206, %cst_136 [1] : vector<16x32xf32> to vector<16xf32>
    %208 = vector.shape_cast %207 : vector<16xf32> to vector<16x1xf32>
    %cst_137 = arith.constant 3.200000e+01 : f32
    %209 = vector.broadcast %cst_137 : f32 to vector<16x1xf32>
    %210 = arith.divf %208, %209 : vector<16x1xf32>
    %cst_138 = arith.constant 9.99999974E-6 : f32
    %211 = vector.broadcast %cst_138 : f32 to vector<16x1xf32>
    %212 = arith.addf %210, %211 : vector<16x1xf32>
    %213 = math.rsqrt %212 : vector<16x1xf32>
    %214 = vector.broadcast %213 : vector<16x1xf32> to vector<16x32xf32>
    %215 = arith.mulf %205, %214 : vector<16x32xf32>
    %c0_139 = arith.constant 0 : index
    %c0_140 = arith.constant 0 : index
    %216 = vector.load %arg16[%c0_139, %c0_140] : memref<1x32xf32, #tpu.memory_space<vmem>>, vector<1x32xf32>
    %217 = vector.broadcast %216 : vector<1x32xf32> to vector<16x32xf32>
    %218 = arith.mulf %215, %217 : vector<16x32xf32>
    %c0_141 = arith.constant 0 : index
    %c0_142 = arith.constant 0 : index
    %219 = vector.load %arg17[%c0_141, %c0_142] : memref<1x32xf32, #tpu.memory_space<vmem>>, vector<1x32xf32>
    %220 = vector.broadcast %219 : vector<1x32xf32> to vector<16x32xf32>
    %221 = arith.addf %218, %220 : vector<16x32xf32>
    %222 = vector.shape_cast %221 : vector<16x32xf32> to vector<2x8x32xf32>
    %c0_143 = arith.constant 0 : index
    %c0_144 = arith.constant 0 : index
    %c0_145 = arith.constant 0 : index
    %223 = vector.load %arg18[%c0_143, %c0_144, %c0_145] : memref<2x8x32xf32, #tpu.memory_space<vmem>>, vector<2x8x32xf32>
    tpu.vector_store %arg18[%c0_143, %c0_144, %c0_145], %222 {strides = array<i32>} : memref<2x8x32xf32, #tpu.memory_space<vmem>>, vector<2x8x32xf32>,
    return
  }
  func.func @transform_0(%arg0: i32) -> (i32, i32, i32) {
    %c0_i32 = arith.constant 0 : i32
    %c0_i32_0 = arith.constant 0 : i32
    %c0_i32_1 = arith.constant 0 : i32
    return %arg0, %c0_i32, %c0_i32_0 : i32, i32, i32
  }
  func.func @transform_1(%arg0: i32) -> (i32, i32, i32) {
    %c0_i32 = arith.constant 0 : i32
    %c0_i32_0 = arith.constant 0 : i32
    %c0_i32_1 = arith.constant 0 : i32
    %c0_i32_2 = arith.constant 0 : i32
    return %c0_i32, %c0_i32_0, %c0_i32_1 : i32, i32, i32
  }
  func.func @transform_2(%arg0: i32) -> (i32, i32, i32) {
    %c0_i32 = arith.constant 0 : i32
    %c0_i32_0 = arith.constant 0 : i32
    %c0_i32_1 = arith.constant 0 : i32
    %c0_i32_2 = arith.constant 0 : i32
    return %c0_i32, %c0_i32_0, %c0_i32_1 : i32, i32, i32
  }
  func.func @transform_3(%arg0: i32) -> (i32, i32, i32) {
    %c0_i32 = arith.constant 0 : i32
    %c0_i32_0 = arith.constant 0 : i32
    %c0_i32_1 = arith.constant 0 : i32
    %c0_i32_2 = arith.constant 0 : i32
    return %c0_i32, %c0_i32_0, %c0_i32_1 : i32, i32, i32
  }
  func.func @transform_4(%arg0: i32) -> (i32, i32, i32) {
    %c0_i32 = arith.constant 0 : i32
    %c0_i32_0 = arith.constant 0 : i32
    %c0_i32_1 = arith.constant 0 : i32
    %c0_i32_2 = arith.constant 0 : i32
    return %c0_i32, %c0_i32_0, %c0_i32_1 : i32, i32, i32
  }
  func.func @transform_5(%arg0: i32) -> (i32, i32, i32) {
    %c0_i32 = arith.constant 0 : i32
    %c0_i32_0 = arith.constant 0 : i32
    %c0_i32_1 = arith.constant 0 : i32
    %c0_i32_2 = arith.constant 0 : i32
    return %c0_i32, %c0_i32_0, %c0_i32_1 : i32, i32, i32
  }
  func.func @transform_6(%arg0: i32) -> (i32, i32, i32) {
    %c0_i32 = arith.constant 0 : i32
    %c0_i32_0 = arith.constant 0 : i32
    %c0_i32_1 = arith.constant 0 : i32
    %c0_i32_2 = arith.constant 0 : i32
    return %c0_i32, %c0_i32_0, %c0_i32_1 : i32, i32, i32
  }
  func.func @transform_7(%arg0: i32) -> (i32, i32) {
    %c0_i32 = arith.constant 0 : i32
    %c0_i32_0 = arith.constant 0 : i32
    %c0_i32_1 = arith.constant 0 : i32
    return %c0_i32, %c0_i32_0 : i32, i32
  }
  func.func @transform_8(%arg0: i32) -> (i32, i32) {
    %c0_i32 = arith.constant 0 : i32
    %c0_i32_0 = arith.constant 0 : i32
    %c0_i32_1 = arith.constant 0 : i32
    return %c0_i32, %c0_i32_0 : i32, i32
  }
  func.func @transform_9(%arg0: i32) -> (i32, i32) {
    %c0_i32 = arith.constant 0 : i32
    %c0_i32_0 = arith.constant 0 : i32
    %c0_i32_1 = arith.constant 0 : i32
    return %c0_i32, %c0_i32_0 : i32, i32
  }
  func.func @transform_10(%arg0: i32) -> (i32, i32) {
    %c0_i32 = arith.constant 0 : i32
    %c0_i32_0 = arith.constant 0 : i32
    %c0_i32_1 = arith.constant 0 : i32
    return %c0_i32, %c0_i32_0 : i32, i32
  }
  func.func @transform_11(%arg0: i32) -> (i32, i32) {
    %c0_i32 = arith.constant 0 : i32
    %c0_i32_0 = arith.constant 0 : i32
    %c0_i32_1 = arith.constant 0 : i32
    return %c0_i32, %c0_i32_0 : i32, i32
  }
  func.func @transform_12(%arg0: i32) -> (i32, i32) {
    %c0_i32 = arith.constant 0 : i32
    %c0_i32_0 = arith.constant 0 : i32
    %c0_i32_1 = arith.constant 0 : i32
    return %c0_i32, %c0_i32_0 : i32, i32
  }
  func.func @transform_13(%arg0: i32) -> (i32, i32) {
    %c0_i32 = arith.constant 0 : i32
    %c0_i32_0 = arith.constant 0 : i32
    %c0_i32_1 = arith.constant 0 : i32
    return %c0_i32, %c0_i32_0 : i32, i32
  }
  func.func @transform_14(%arg0: i32) -> (i32, i32) {
    %c0_i32 = arith.constant 0 : i32
    %c0_i32_0 = arith.constant 0 : i32
    %c0_i32_1 = arith.constant 0 : i32
    return %c0_i32, %c0_i32_0 : i32, i32
  }
  func.func @transform_15(%arg0: i32) -> (i32, i32) {
    %c0_i32 = arith.constant 0 : i32
    %c0_i32_0 = arith.constant 0 : i32
    %c0_i32_1 = arith.constant 0 : i32
    return %c0_i32, %c0_i32_0 : i32, i32
  }
  func.func @transform_16(%arg0: i32) -> (i32, i32) {
    %c0_i32 = arith.constant 0 : i32
    %c0_i32_0 = arith.constant 0 : i32
    %c0_i32_1 = arith.constant 0 : i32
    return %c0_i32, %c0_i32_0 : i32, i32
  }
  func.func @transform_17(%arg0: i32) -> (i32, i32, i32) {
    %c0_i32 = arith.constant 0 : i32
    %c0_i32_0 = arith.constant 0 : i32
    %c0_i32_1 = arith.constant 0 : i32
    return %arg0, %c0_i32, %c0_i32_0 : i32, i32, i32
  }
}

</mosaic_0001>

<bundles_post_ra>
// kernel: tpu_custom_call.1
= control target key start
LH: loop header
LB: loop body
LE: loop exit
PB: predicated region body
PF: predicated region fallthrough
CT: control target
= control target key end

     0   :  { %s2106_s0 = inlined_call_operand.vmem [shape: f32[2,8,32], index: 0, kind: input, shape index: {}]   ;;  %s2107_s1 = inlined_call_operand.vmem [shape: f32[4,32,8], index: 1, kind: input, shape index: {}]   ;;  %s2108_s2 = inlined_call_operand.vmem [shape: f32[4,32,8], index: 2, kind: input, shape index: {}]   ;;  %s2109_s3 = inlined_call_operand.vmem [shape: f32[4,32,8], index: 3, kind: input, shape index: {}]   ;;  %s2110_s4 = inlined_call_operand.vmem [shape: f32[4,1,8], index: 4, kind: input, shape index: {}]   ;;  %s2111_s5 = inlined_call_operand.vmem [shape: f32[4,1,8], index: 5, kind: input, shape index: {}]   ;;  %s2112_s6 = inlined_call_operand.vmem [shape: f32[4,1,8], index: 6, kind: input, shape index: {}]   ;;  %s2113_s7 = inlined_call_operand.vmem [shape: f32[32,32], index: 7, kind: input, shape index: {}]   ;;  %s2114_s8 = inlined_call_operand.vmem [shape: f32[1,32], index: 8, kind: input, shape index: {}]   ;;  %s2115_s9 = inlined_call_operand.vmem [shape: f32[32,128], index: 9, kind: input, shape index: {}]   ;;  %s2116_s10 = inlined_call_operand.vmem [shape: f32[1,128], index: 10, kind: input, shape index: {}]   ;;  %s2117_s11 = inlined_call_operand.vmem [shape: f32[128,32], index: 11, kind: input, shape index: {}]   ;;  %s2118_s12 = inlined_call_operand.vmem [shape: f32[1,32], index: 12, kind: input, shape index: {}]   ;;  %s2119_s13 = inlined_call_operand.vmem [shape: f32[1,32], index: 13, kind: input, shape index: {}]   ;;  %s2120_s14 = inlined_call_operand.vmem [shape: f32[1,32], index: 14, kind: input, shape index: {}]   ;;  %s2121_s15 = inlined_call_operand.vmem [shape: f32[1,32], index: 15, kind: input, shape index: {}]   ;;  %s2122_s16 = inlined_call_operand.vmem [shape: f32[1,32], index: 16, kind: input, shape index: {}]   ;;  %s2123_s17 = inlined_call_operand.hbm [shape: f32[2,8,32], index: 17, kind: output, shape index: {}]  }
   0x1   :  { %2126 = sst [smem:[#allocation6_spill]] %s2106_s0 }
   0x2   :  { %2127 = sst [smem:[#allocation7_spill]] %s2107_s1 }
   0x3   :  { %v100_v0 = vld [vmem:[%s2108_s2 + $0x18] sm:$0xff]  ;;  %v99_v1 = vld [vmem:[%s2108_s2 + $0x10] sm:$0xff]  ;;  %s2128_s0 = sld [smem:[#allocation7_spill]]  ;;  %v98_v3 = vld [vmem:[%s2108_s2 + $0x8] sm:$0xff]  ;;  %vm67_vm0 = vcmask 261120  }
   0x4   :  { %117 = vmatpush.msra.mxu2 %v100_v0  ;;  %v97_v4 = vld [vmem:[%s2108_s2] sm:$0xff]  ;;  %s2129_s24 = sld [smem:[#allocation6_spill]] }
   0x6   :  { %118 = vmatpush.msra.mxu2 %v99_v1 }
   0x8   :  { %119 = vmatpush.msra.mxu2 %v98_v3 }
   0x9   :  { %v62_v2 = vld [vmem:[%s2128_s0 + $0x18] sm:$0xff]  ;;  %v61_v5 = vld [vmem:[%s2128_s0 + $0x10] sm:$0xff]  ;;  %v60_v7 = vld [vmem:[%s2128_s0 + $0x8] sm:$0xff] }
   0xa   :  { %86 = vmatpush.msra.mxu0 %v62_v2  ;;  %v1659_v6 = vld [vmem:[%s2129_s24] sm:$0xff]  ;;  %120 = vmatpush.msra.mxu2 %v97_v4 }
   0xb   :  { %v59_v8 = vld [vmem:[%s2128_s0] sm:$0xff]  ;;  %1350 = vmatmul.msk.f32.vlgmr.msra.gmra.mxu2 %vm67_vm0, %v1659_v6 }
   0xc   :  { %87 = vmatpush.msra.mxu0 %v61_v5 }
   0xe   :  { %88 = vmatpush.msra.mxu0 %v60_v7 }
  0x10   :  { %89 = vmatpush.msra.mxu0 %v59_v8 }
  0x11   :  { %1348 = vmatmul.msk.f32.vlgmr.msra.gmra.mxu0 %vm67_vm0, %v1659_v6 }
  0x12   :  { %22 = vsyncpa [#allocation4], 0  ;;  %v1674_v9 = vld [vmem:[%s2129_s24 + $0x8] sm:$0xff]  ;;  %v131_v10 = vld [vmem:[%s2109_s3 + $0x18] sm:$0xff]  ;;  %vm159_vm1 = vcmask 64512   ;;  %s1543_s19 = smov 8  }
  0x13   :  { %1351 = vmatmul.msk.f32.gmra.mxu2 %vm67_vm0, %v1674_v9  ;;  %v130_v11 = vld [vmem:[%s2109_s3 + $0x10] sm:$0xff]  ;;  %v129_v12 = vld [vmem:[%s2109_s3 + $0x8] sm:$0xff]  ;;  %v128_v13 = vld [vmem:[%s2109_s3] sm:$0xff]  ;;  %s1544_s21 = smov 24   ;;  %s1336_s30 = sshll.u32 %s2123_s17, 4  ;;  %s1337_s30 = int_to_ptr.hbm [resolvable:$true] %s1336_s30 }
  0x14   :  { %148 = vmatpush.msrb.mxu2 %v131_v10  ;;  %v1455_v14 = vld [vmem:[%s2111_s5] ss:$0 sm:$0xff]  ;;  %v1370_v24 = vld [vmem:[%s2108_s2 + $0x38] sm:$0xff]  ;;  %v1369_v25 = vld [vmem:[%s2108_s2 + $0x30] sm:$0xff] }
  0x15   :  { %v1456_v16 = vld [vmem:[%s2110_s4] ss:$0 sm:$0xff]  ;;  %v1368_v32 = vld [vmem:[%s2108_s2 + $0x28] sm:$0xff]  ;;  %v1363_v35 = vld [vmem:[%s2128_s0 + $0x38] sm:$0xff] }
  0x16   :  { %149 = vmatpush.msrb.mxu2 %v130_v11  ;;  %v1457_v30 = vld [vmem:[%s2112_s6] ss:$0 sm:$0xff]  ;;  %332 = vmatpush.msra.mxu1 %v1363_v35  ;;  %v1362_v36 = vld [vmem:[%s2128_s0 + $0x30] sm:$0xff]  ;;  %v1361_v37 = vld [vmem:[%s2128_s0 + $0x28] sm:$0xff] }
  0x17   :  { %v1367_v33 = vld [vmem:[%s2108_s2 + $0x20] sm:$0xff]  ;;  %v1377_v57 = vld [vmem:[%s2109_s3 + $0x38] sm:$0xff]  ;;  %v1376_v58 = vld [vmem:[%s2109_s3 + $0x30] sm:$0xff] }
  0x18   :  { %150 = vmatpush.msrb.mxu2 %v129_v12  ;;  %333 = vmatpush.msra.mxu1 %v1362_v36  ;;  %v1360_v40 = vld [vmem:[%s2128_s0 + $0x20] sm:$0xff]  ;;  %v1375_v59 = vld [vmem:[%s2109_s3 + $0x28] sm:$0xff]  ;;  %v1390_v61 = vld [vmem:[%s2128_s0 + $0x58] sm:$0xff] }
  0x19   :  { %1349 = vmatmul.msk.f32.gmra.mxu0 %vm67_vm0, %v1674_v9  ;;  %v1458_v49 = vld [vmem:[%s2111_s5 + $0x1] ss:$0 sm:$0xff]  ;;  %v1389_v62 = vld [vmem:[%s2128_s0 + $0x50] sm:$0xff]  ;;  %v1397_v2 = vld [vmem:[%s2108_s2 + $0x58] sm:$0xff] }
  0x1a   :  { %151 = vmatpush.msrb.mxu2 %v128_v13  ;;  %334 = vmatpush.msra.mxu1 %v1361_v37  ;;  %v1459_v52 = vld [vmem:[%s2110_s4 + $0x1] ss:$0 sm:$0xff]  ;;  %v1388_v3 = vld [vmem:[%s2128_s0 + $0x48] sm:$0xff]  ;;  %v1396_v4 = vld [vmem:[%s2108_s2 + $0x50] sm:$0xff] }
  0x1b   :  { %1352 = vmatmul.msk.f32.vlgmr.msrb.gmra.mxu2 %vm67_vm0, %v1659_v6  ;;  %v1374_v60 = vld [vmem:[%s2109_s3 + $0x20] sm:$0xff]  ;;  %v1395_v7 = vld [vmem:[%s2108_s2 + $0x48] sm:$0xff] }
  0x1c   :  { %365 = vmatpush.msra.mxu2 %v1370_v24  ;;  %335 = vmatpush.msra.mxu1 %v1360_v40  ;;  %v1387_v5 = vld [vmem:[%s2128_s0 + $0x40] sm:$0xff]  ;;  %v1403_v24 = vld [vmem:[%s2109_s3 + $0x50] sm:$0xff] }
  0x1d   :  { %1365 = vmatmul.msk.f32.vlgmr.msra.gmra.mxu1 %vm67_vm0, %v1659_v6  ;;  %v1394_v8 = vld [vmem:[%s2108_s2 + $0x40] sm:$0xff] }
  0x1e   :  { %366 = vmatpush.msra.mxu2 %v1369_v25  ;;  %v1460_v10 = vld [vmem:[%s2112_s6 + $0x1] ss:$0 sm:$0xff]  ;;  %v1402_v25 = vld [vmem:[%s2109_s3 + $0x48] sm:$0xff] }
  0x20   :  { %367 = vmatpush.msra.mxu2 %v1368_v32 }
  0x22   :  { %368 = vmatpush.msra.mxu2 %v1367_v33 }
  0x23   :  { %1353 = vmatmul.msk.f32.gmra.mxu2 %vm67_vm0, %v1674_v9 }
  0x2b   :  { %1372 = vmatmul.msk.f32.vlgmr.msra.gmra.mxu2 %vm67_vm0, %v1659_v6 }
  0x33   :  { %1373 = vmatmul.msk.f32.gmra.mxu2 %vm67_vm0, %v1674_v9 }
  0x8e   :  { %v91_v15 = vpop.f32.mrf.mxu0  ;;  %v122_v17 = vpop.f32.mrf.mxu2 }
  0x8f   :  { %v123_v18 = vadd.f32 %v1455_v14, %v122_v17  ;;  %v92_v19 = vadd.f32 %v1456_v16, %v91_v15 }
  0x91   :  { %1354 = vmatpush.xpose.msk.msra.mxu3 %vm159_vm1, %v123_v18 }
  0x94   :  { %1355 = vmatmul.msk.f32.vlgmr.msra.gmra.mxu3 %vm159_vm1, %v92_v19 }
  0x96   :  { %v94_v20 = vpop.f32.mrf.mxu0  ;;  %v125_v21 = vpop.f32.mrf.mxu2 }
  0x97   :  { %v126_v22 = vadd.f32 %v1455_v14, %v125_v21  ;;  %v95_v23 = vadd.f32 %v1456_v16, %v94_v20  ;;  %v1461_v20 = vld [vmem:[%s2111_s5 + $0x2] ss:$0 sm:$0xff] }
  0x99   :  { %1356 = vmatpush.xpose.msk.msrb.mxu3 %vm159_vm1, %v126_v22 }
  0x9a   :  { %v337_v53 = vpop.f32.mrf.mxu1 }
  0x9b   :  { %v338_v54 = vadd.f32 %v1459_v52, %v337_v53 }
  0x9c   :  { %1357 = vmatmul.msk.f32.vlgmr.msrb.gmra.mxu3 %vm159_vm1, %v95_v23  ;;  %v1404_v23 = vld [vmem:[%s2109_s3 + $0x58] sm:$0xff] }
  0x9e   :  { %v153_v31 = vpop.f32.mrf.mxu2 }
  0x9f   :  { %v154_v34 = vadd.f32 %v1457_v30, %v153_v31 }
  0xa1   :  { %278 = vmatpush.msra.mxu3 %v154_v34 }
  0xa3   :  { %1445 = vmatpush.msrb.mxu3 %v1363_v35 }
  0xa5   :  { %1446 = vmatpush.msrb.mxu3 %v1362_v36 }
  0xa6   :  { %v156_v38 = vpop.f32.mrf.mxu2 }
  0xa7   :  { %v157_v39 = vadd.f32 %v1457_v30, %v156_v38  ;;  %1447 = vmatpush.msrb.mxu3 %v1361_v37  ;;  %v1462_v37 = vld [vmem:[%s2110_s4 + $0x2] ss:$0 sm:$0xff] }
  0xa9   :  { %301 = vmatpush.msrb.mxu0 %v157_v39  ;;  %1448 = vmatpush.msrb.mxu3 %v1360_v40 }
  0xae   :  { %v370_v50 = vpop.f32.mrf.mxu2 }
  0xaf   :  { %v371_v51 = vadd.f32 %v1458_v49, %v370_v50  ;;  %v1415_v50 = vld [vmem:[%s2128_s0 + $0x68] sm:$0xff] }
  0xb1   :  { %1381 = vmatpush.xpose.msk.msra.mxu0 %vm159_vm1, %v371_v51  ;;  %v1414_v51 = vld [vmem:[%s2128_s0 + $0x60] sm:$0xff] }
  0xb6   :  { %v373_v55 = vpop.f32.mrf.mxu2 }
  0xb7   :  { %v374_v56 = vadd.f32 %v1458_v49, %v373_v55  ;;  %v1416_v49 = vld [vmem:[%s2128_s0 + $0x70] sm:$0xff] }
 0x117   :  { %v183_v26 = vpop.f32.mrf.mxu3 }
 0x118   :  { %v212_v27 = vsel %vm159_vm1, %v183_v26, -inf }
 0x119   :  { %213 = vmax.xlane.f32.xlu0 %v212_v27  ;;  %v1401_v27 = vld [vmem:[%s2109_s3 + $0x40] sm:$0xff] }
 0x11f   :  { %v209_v28 = vpop.f32.mrf.mxu3 }
 0x120   :  { %v215_v29 = vsel %vm159_vm1, %v209_v28, -inf }
 0x121   :  { %216 = vmax.xlane.f32.xlu0 %v215_v29 }
 0x18c   :  { %v214_v41 = vpop.xlane.xlu0 %213 }
 0x18d   :  { %v218_v42 = vsub.f32 %v183_v26, %v214_v41 }
 0x18f   :  { %v220_v43 = vmul.f32 1.442695, %v218_v42  ;;  %v1424_v42 = vld [vmem:[%s2108_s2 + $0x78] sm:$0xff] }
 0x191   :  { %1474 = vpow2.f32 %v220_v43  ;;  %v1423_v43 = vld [vmem:[%s2108_s2 + $0x70] sm:$0xff] }
 0x194   :  { %v217_v44 = vpop.xlane.xlu0 %216 }
 0x195   :  { %v219_v45 = vsub.f32 %v209_v28, %v217_v44  ;;  %v1422_v44 = vld [vmem:[%s2108_s2 + $0x68] sm:$0xff] }
 0x197   :  { %v1741_v46 = vpop.eup %1474  ;;  %v222_v47 = vmul.f32 1.442695, %v219_v45  ;;  %v1417_v45 = vld [vmem:[%s2128_s0 + $0x78] sm:$0xff] }
 0x198   :  { %1358 = vmatmul.msk.f32.vlgmr.msra.gmra.mxu3 %vm159_vm1, %v1741_v46 }
 0x199   :  { %1476 = vpow2.f32 %v222_v47  ;;  %398 = vmatpush.msra.mxu3 %v1377_v57  ;;  %v1421_v47 = vld [vmem:[%s2108_s2 + $0x60] sm:$0xff] }
 0x19a   :  { %v1463_v57 = vld [vmem:[%s2112_s6 + $0x2] ss:$0 sm:$0xff] }
 0x19b   :  { %399 = vmatpush.msra.mxu3 %v1376_v58 }
 0x19d   :  { %400 = vmatpush.msra.mxu3 %v1375_v59 }
 0x19f   :  { %v1745_v48 = vpop.eup %1476  ;;  %401 = vmatpush.msra.mxu3 %v1374_v60 }
 0x1a0   :  { %1366 = vmatmul.msk.f32.vlgmr.msrb.gmra.mxu3 %vm67_vm0, %v1674_v9  ;;  %1359 = vmatmul.msk.f32.vlgmr.msrb.gmra.mxu0 %vm159_vm1, %v1745_v48 }
 0x1a1   :  { %1383 = vmatpush.xpose.msk.msrb.mxu0 %vm159_vm1, %v374_v56  ;;  %590 = vmatpush.msrb.mxu3 %v1390_v61 }
 0x1a3   :  { %591 = vmatpush.msrb.mxu3 %v1389_v62 }
 0x1a5   :  { %592 = vmatpush.msrb.mxu3 %v1388_v3  ;;  %v1464_v3 = vld [vmem:[%s2111_s5 + $0x3] ss:$0 sm:$0xff] }
 0x1a7   :  { %593 = vmatpush.msrb.mxu3 %v1387_v5 }
 0x1a8   :  { %1382 = vmatmul.msk.f32.vlgmr.msra.gmra.mxu0 %vm159_vm1, %v338_v54  ;;  %1379 = vmatmul.msk.f32.vlgmr.msra.gmra.mxu3 %vm67_vm0, %v1659_v6 }
 0x1a9   :  { %623 = vmatpush.msra.mxu0 %v1397_v2  ;;  %v224_v2 = vsel %vm159_vm1, %v1741_v46, 0.0 }
 0x1ab   :  { %624 = vmatpush.msra.mxu0 %v1396_v4 }
 0x1ad   :  { %625 = vmatpush.msra.mxu0 %v1395_v7 }
 0x1af   :  { %626 = vmatpush.msra.mxu0 %v1394_v8 }
 0x1b0   :  { %1380 = vmatmul.msk.f32.gmra.mxu3 %vm67_vm0, %v1674_v9 }
 0x1b8   :  { %1392 = vmatmul.msk.f32.vlgmr.msrb.gmra.mxu3 %vm67_vm0, %v1659_v6 }
 0x1c0   :  { %1393 = vmatmul.msk.f32.gmra.mxu3 %vm67_vm0, %v1674_v9 }
 0x21b   :  { %v1782_v63 = vpop.f32.mrf.mxu3 }
 0x21d   :  { %v1814_v11 = vpop.f32.mrf.mxu0 }
 0x223   :  { %v340_v0 = vpop.f32.mrf.mxu3 }
 0x224   :  { %v341_v1 = vadd.f32 %v1459_v52, %v340_v0 }
 0x225   :  { %v432_v14 = vpop.f32.mrf.mxu0 }
 0x226   :  { %1384 = vmatmul.msk.f32.vlgmr.msrb.gmra.mxu0 %vm159_vm1, %v341_v1  ;;  %v461_v19 = vsel %vm159_vm1, %v432_v14, -inf }
 0x22b   :  { %v403_v12 = vpop.f32.mrf.mxu3 }
 0x22c   :  { %v404_v13 = vadd.f32 %v1460_v10, %v403_v12 }
 0x22e   :  { %1399 = vmatmul.msk.f32.vlgmr.msra.gmra.mxu0 %vm67_vm0, %v1659_v6  ;;  %527 = vmatpush.msrb.mxu1 %v404_v13 }
 0x230   :  { %656 = vmatpush.msra.mxu1 %v1404_v23  ;;  %v1429_v23 = vld [vmem:[%s2109_s3 + $0x68] sm:$0xff] }
 0x232   :  { %657 = vmatpush.msra.mxu1 %v1403_v24  ;;  %v1428_v24 = vld [vmem:[%s2109_s3 + $0x60] sm:$0xff] }
 0x233   :  { %v406_v15 = vpop.f32.mrf.mxu3 }
 0x234   :  { %v407_v16 = vadd.f32 %v1460_v10, %v406_v15  ;;  %658 = vmatpush.msra.mxu1 %v1402_v25 }
 0x236   :  { %1400 = vmatmul.msk.f32.gmra.mxu0 %vm67_vm0, %v1674_v9  ;;  %550 = vmatpush.msrb.mxu2 %v407_v16 }
 0x237   :  { %659 = vmatpush.msra.mxu1 %v1401_v27 }
 0x23b   :  { %v595_v36 = vpop.f32.mrf.mxu3 }
 0x23c   :  { %v596_v38 = vadd.f32 %v1462_v37, %v595_v36 }
 0x243   :  { %v598_v40 = vpop.f32.mrf.mxu3 }
 0x244   :  { %v599_v41 = vadd.f32 %v1462_v37, %v598_v40 }
 0x2a3   :  { %v458_v17 = vpop.f32.mrf.mxu0 }
 0x2a4   :  { %v464_v18 = vsel %vm159_vm1, %v458_v17, -inf }
 0x2a5   :  { %465 = vmax.xlane.f32.xlu1 %v464_v18  ;;  %v1465_v18 = vld [vmem:[%s2110_s4 + $0x3] ss:$0 sm:$0xff] }
 0x2ab   :  { %v628_v21 = vpop.f32.mrf.mxu0 }
 0x2ac   :  { %v629_v22 = vadd.f32 %v1461_v20, %v628_v21 }
 0x2ad   :  { %462 = vmax.xlane.f32.xlu1 %v461_v19  ;;  %v1431_v19 = vld [vmem:[%s2109_s3 + $0x78] sm:$0xff] }
 0x2ae   :  { %1408 = vmatpush.xpose.msk.msra.mxu2 %vm159_vm1, %v629_v22 }
 0x2b3   :  { %v631_v30 = vpop.f32.mrf.mxu0 }
 0x2b4   :  { %v632_v33 = vadd.f32 %v1461_v20, %v631_v30  ;;  %v1430_v20 = vld [vmem:[%s2109_s3 + $0x70] sm:$0xff] }
 0x318   :  { %v466_v26 = vpop.xlane.xlu1 %465 }
 0x319   :  { %v468_v28 = vsub.f32 %v458_v17, %v466_v26 }
 0x31b   :  { %v471_v29 = vmul.f32 1.442695, %v468_v28 }
 0x31d   :  { %1478 = vpow2.f32 %v471_v29 }
 0x320   :  { %v463_v31 = vpop.xlane.xlu1 %462 }
 0x321   :  { %v467_v32 = vsub.f32 %v432_v14, %v463_v31 }
 0x323   :  { %v1479_v34 = vpop.eup %1478  ;;  %v469_v35 = vmul.f32 1.442695, %v467_v32 }
 0x324   :  { %1386 = vmatmul.msk.f32.vlgmr.msrb.gmra.mxu2 %vm159_vm1, %v1479_v34  ;;  %v476_v1 = vsel %vm159_vm1, %v1479_v34, 0.0 }
 0x325   :  { %1480 = vpow2.f32 %v469_v35  ;;  %1410 = vmatpush.xpose.msk.msrb.mxu2 %vm159_vm1, %v632_v33 }
 0x32b   :  { %v1481_v39 = vpop.eup %1480 }
 0x32c   :  { %1385 = vmatmul.msk.f32.vlgmr.msrb.gmra.mxu1 %vm159_vm1, %v1481_v39  ;;  %1409 = vmatmul.msk.f32.vlgmr.msra.gmra.mxu2 %vm159_vm1, %v596_v38  ;;  %v473_v0 = vsel %vm159_vm1, %v1481_v39, 0.0 }
 0x32d   :  { %881 = vmatpush.msra.mxu2 %v1424_v42  ;;  %848 = vmatpush.msrb.mxu1 %v1417_v45 }
 0x32f   :  { %882 = vmatpush.msra.mxu2 %v1423_v43  ;;  %849 = vmatpush.msrb.mxu1 %v1416_v49 }
 0x331   :  { %883 = vmatpush.msra.mxu2 %v1422_v44  ;;  %850 = vmatpush.msrb.mxu1 %v1415_v50 }
 0x333   :  { %884 = vmatpush.msra.mxu2 %v1421_v47  ;;  %851 = vmatpush.msrb.mxu1 %v1414_v51 }
 0x334   :  { %1411 = vmatmul.msk.f32.vlgmr.msrb.gmra.mxu2 %vm159_vm1, %v599_v41  ;;  %1406 = vmatmul.msk.f32.vlgmr.msra.gmra.mxu1 %vm67_vm0, %v1659_v6 }
 0x33c   :  { %1407 = vmatmul.msk.f32.gmra.mxu1 %vm67_vm0, %v1674_v9  ;;  %1426 = vmatmul.msk.f32.vlgmr.msra.gmra.mxu2 %vm67_vm0, %v1659_v6 }
 0x344   :  { %1427 = vmatmul.msk.f32.gmra.mxu2 %vm67_vm0, %v1674_v9  ;;  %1419 = vmatmul.msk.f32.vlgmr.msrb.gmra.mxu1 %vm67_vm0, %v1659_v6 }
 0x34c   :  { %1420 = vmatmul.msk.f32.gmra.mxu1 %vm67_vm0, %v1674_v9 }
 0x3a7   :  { %v1878_v52 = vpop.f32.mrf.mxu2 }
 0x3a9   :  { %v1880_v54 = vpop.f32.mrf.mxu1 }
 0x3af   :  { %v690_v53 = vpop.f32.mrf.mxu2 }
 0x3b0   :  { %v719_v60 = vsel %vm159_vm1, %v690_v53, -inf }
 0x3b1   :  { %v661_v58 = vpop.f32.mrf.mxu1 }
 0x3b2   :  { %v662_v59 = vadd.f32 %v1463_v57, %v661_v58 }
 0x3b4   :  { %785 = vmatpush.msra.mxu3 %v662_v59 }
 0x3b6   :  { %914 = vmatpush.msrb.mxu3 %v1431_v19 }
 0x3b7   :  { %v716_v55 = vpop.f32.mrf.mxu2 }
 0x3b8   :  { %v722_v56 = vsel %vm159_vm1, %v716_v55, -inf  ;;  %915 = vmatpush.msrb.mxu3 %v1430_v20 }
 0x3b9   :  { %723 = vmax.xlane.f32.xlu2 %v722_v56  ;;  %v664_v61 = vpop.f32.mrf.mxu1 }
 0x3ba   :  { %v665_v62 = vadd.f32 %v1463_v57, %v664_v61  ;;  %916 = vmatpush.msrb.mxu3 %v1429_v23 }
 0x3bc   :  { %808 = vmatpush.msrb.mxu0 %v665_v62  ;;  %917 = vmatpush.msrb.mxu3 %v1428_v24 }
 0x3bf   :  { %v886_v4 = vpop.f32.mrf.mxu2 }
 0x3c0   :  { %v887_v5 = vadd.f32 %v1464_v3, %v886_v4 }
 0x3c1   :  { %720 = vmax.xlane.f32.xlu2 %v719_v60  ;;  %v853_v46 = vpop.f32.mrf.mxu1 }
 0x3c2   :  { %1435 = vmatpush.xpose.msk.msra.mxu0 %vm159_vm1, %v887_v5  ;;  %v854_v22 = vadd.f32 %v1465_v18, %v853_v46 }
 0x3c7   :  { %v889_v12 = vpop.f32.mrf.mxu2 }
 0x3c8   :  { %v890_v15 = vadd.f32 %v1464_v3, %v889_v12 }
 0x3c9   :  { %474 = vadd.xlane.f32.xlu2 %v473_v0  ;;  %v856_v26 = vpop.f32.mrf.mxu1 }
 0x3ca   :  { %v857_v28 = vadd.f32 %v1465_v18, %v856_v26 }
 0x3d1   :  { %477 = vadd.xlane.f32.xlu2 %v476_v1 }
 0x3d9   :  { %225 = vadd.xlane.f32.xlu2 %v224_v2 }
 0x42c   :  { %v724_v7 = vpop.xlane.xlu2 %723 }
 0x42d   :  { %v726_v8 = vsub.f32 %v716_v55, %v724_v7  ;;  %v227_v55 = vsel %vm159_vm1, %v1745_v48, 0.0 }
 0x42f   :  { %v729_v10 = vmul.f32 1.442695, %v726_v8 }
 0x431   :  { %1482 = vpow2.f32 %v729_v10 }
 0x434   :  { %v721_v13 = vpop.xlane.xlu2 %720 }
 0x435   :  { %v725_v14 = vsub.f32 %v690_v53, %v721_v13 }
 0x437   :  { %v1483_v16 = vpop.eup %1482  ;;  %v727_v17 = vmul.f32 1.442695, %v725_v14 }
 0x438   :  { %1413 = vmatmul.msk.f32.vlgmr.msrb.gmra.mxu0 %vm159_vm1, %v1483_v16  ;;  %v734_v53 = vsel %vm159_vm1, %v1483_v16, 0.0 }
 0x439   :  { %1484 = vpow2.f32 %v727_v17  ;;  %1437 = vmatpush.xpose.msk.msrb.mxu0 %vm159_vm1, %v890_v15 }
 0x43c   :  { %v1906_v21 = vpop.xlane.xlu2 %474 }
 0x43d   :  { %vm484_vm15 = vweird.f32 %v1906_v21 }
 0x43f   :  { %v1485_v25 = vpop.eup %1484 }
 0x440   :  { %1412 = vmatmul.msk.f32.vlgmr.msra.gmra.mxu3 %vm159_vm1, %v1485_v25  ;;  %1436 = vmatmul.msk.f32.vlgmr.msra.gmra.mxu0 %vm159_vm1, %v854_v22  ;;  %v731_v47 = vsel %vm159_vm1, %v1485_v25, 0.0 }
 0x444   :  { %v1916_v27 = vpop.xlane.xlu2 %477 }
 0x445   :  { %vm499_vm11 = vweird.f32 %v1916_v27 }
 0x448   :  { %1438 = vmatmul.msk.f32.vlgmr.msrb.gmra.mxu0 %vm159_vm1, %v857_v28  ;;  %1433 = vmatmul.msk.f32.vlgmr.msrb.gmra.mxu3 %vm67_vm0, %v1659_v6  ;;  %v505_v28 = vand.u32 2147483648, %v1916_v27 }
 0x44c   :  { %v226_v29 = vpop.xlane.xlu2 %225 }
 0x44d   :  { %1486 = vrcp.f32 %v226_v29  ;;  %v241_v33 = vand.u32 2147483648, %v226_v29  ;;  %v239_v35 = vand.u32 2147483647, %v226_v29  ;;  %vm235_vm3 = vweird.f32 %v226_v29 }
 0x44e   :  { %1488 = vrcp.f32 %v1916_v27 }
 0x44f   :  { %v242_v37 = vor.u32 1.1754944e-38, %v241_v33  ;;  %vm240_vm5 = vcmp.eq.f32.partialorder %v239_v35, 8.507059e+37  ;;  %v506_v35 = vor.u32 1.1754944e-38, %v505_v28 }
 0x450   :  { %1434 = vmatmul.msk.f32.gmra.mxu3 %vm67_vm0, %v1674_v9 }
 0x453   :  { %v1487_v30 = vpop.eup %1486 }
 0x454   :  { %v231_v31 = vmul.f32 %v1487_v30, %v226_v29  ;;  %vm236_vm2 = vweird.f32 %v1487_v30  ;;  %v1489_v1 = vpop.eup %1488 }
 0x455   :  { %vm237_vm4 = vmor %vm235_vm3, %vm236_vm2  ;;  %v495_v4 = vmul.f32 %v1489_v1, %v1916_v27  ;;  %vm500_vm10 = vweird.f32 %v1489_v1 }
 0x456   :  { %v232_v32 = vsub.f32 1.0, %v231_v31  ;;  %vm501_vm12 = vmor %vm499_vm11, %vm500_vm10 }
 0x457   :  { %v496_v10 = vsub.f32 1.0, %v495_v4 }
 0x458   :  { %v233_v34 = vmul.f32 %v1487_v30, %v232_v32  ;;  %v503_v32 = vand.u32 2147483647, %v1916_v27  ;;  %v490_v27 = vand.u32 2147483648, %v1906_v21 }
 0x459   :  { %v497_v46 = vmul.f32 %v1489_v1, %v496_v10 }
 0x45a   :  { %v234_v36 = vadd.f32 %v1487_v30, %v233_v34  ;;  %vm504_vm13 = vcmp.eq.f32.partialorder %v503_v32, 8.507059e+37 }
 0x45b   :  { %v498_v25 = vadd.f32 %v1489_v1, %v497_v46 }
 0x45c   :  { %v238_v38 = vsel %vm237_vm4, %v1487_v30, %v234_v36 }
 0x45d   :  { %v243_v39 = vsel %vm240_vm5, %v242_v37, %v238_v38  ;;  %v502_v33 = vsel %vm501_vm12, %v1489_v1, %v498_v25  ;;  %vm565_vm12 = vcmask 130112  }
 0x45e   :  { %v306_v40 = vmul.f32 %v1782_v63, %v243_v39  ;;  %v1466_v63 = vld [vmem:[%s2112_s6 + $0x3] ss:$0 sm:$0xff]  ;;  %s1542_s6 = smov 16   ;;  %v507_v39 = vsel %vm504_vm13, %v506_v35, %v502_v33 }
 0x460   :  { %308 = vst.msk [vmem:[#allocation2] sm:$0xff] %vm159_vm1, %v306_v40 }
 0x4b5   :  { %v1925_v41 = vpop.f32.mrf.mxu0 }
 0x4bd   :  { %v948_v42 = vpop.f32.mrf.mxu0 }
 0x4be   :  { %v977_v43 = vsel %vm159_vm1, %v948_v42, -inf }
 0x4bf   :  { %978 = vmax.xlane.f32.xlu0 %v977_v43 }
 0x4c3   :  { %v1928_v44 = vpop.f32.mrf.mxu3 }
 0x4c5   :  { %v974_v45 = vpop.f32.mrf.mxu0 }
 0x4c6   :  { %v980_v49 = vsel %vm159_vm1, %v974_v45, -inf }
 0x4c7   :  { %732 = vadd.xlane.f32.xlu0 %v731_v47  ;;  %981 = vmax.xlane.f32.xlu1 %v980_v49 }
 0x4cb   :  { %v919_v50 = vpop.f32.mrf.mxu3 }
 0x4cc   :  { %v920_v51 = vadd.f32 %v1466_v63, %v919_v50 }
 0x4ce   :  { %1043 = vmatpush.msra.mxu1 %v920_v51 }
 0x4cf   :  { %735 = vadd.xlane.f32.xlu0 %v734_v53 }
 0x4d3   :  { %v922_v56 = vpop.f32.mrf.mxu3 }
 0x4d4   :  { %v923_v57 = vadd.f32 %v1466_v63, %v922_v56  ;;  %v488_v63 = vand.u32 2147483647, %v1906_v21 }
 0x4d6   :  { %1066 = vmatpush.msrb.mxu2 %v923_v57 }
 0x4d7   :  { %228 = vadd.xlane.f32.xlu0 %v227_v55  ;;  %v491_v55 = vor.u32 1.1754944e-38, %v490_v27 }
 0x532   :  { %v979_v58 = vpop.xlane.xlu0 %978 }
 0x533   :  { %v983_v59 = vsub.f32 %v948_v42, %v979_v58 }
 0x535   :  { %v985_v60 = vmul.f32 1.442695, %v983_v59 }
 0x537   :  { %1490 = vpow2.f32 %v985_v60 }
 0x53a   :  { %v733_v61 = vpop.xlane.xlu0 %732  ;;  %v982_v62 = vpop.xlane.xlu1 %981 }
 0x53b   :  { %1492 = vrcp.f32 %v733_v61  ;;  %v984_v0 = vsub.f32 %v974_v45, %v982_v62  ;;  %v748_v16 = vand.u32 2147483648, %v733_v61  ;;  %v746_v18 = vand.u32 2147483647, %v733_v61 }
 0x53c   :  { %1494 = vrcp.f32 %v1906_v21  ;;  %vm742_vm7 = vweird.f32 %v733_v61  ;;  %v556_v45 = vmul.f32 %v1878_v52, %v507_v39 }
 0x53d   :  { %v1491_v2 = vpop.eup %1490  ;;  %v987_v3 = vmul.f32 1.442695, %v984_v0  ;;  %v749_v22 = vor.u32 1.1754944e-38, %v748_v16  ;;  %vm747_vm9 = vcmp.eq.f32.partialorder %v746_v18, 8.507059e+37 }
 0x53e   :  { %1439 = vmatmul.msk.f32.vlgmr.msra.gmra.mxu1 %vm159_vm1, %v1491_v2  ;;  %v989_v48 = vsel %vm159_vm1, %v1491_v2, 0.0 }
 0x53f   :  { %1496 = vpow2.f32 %v987_v3  ;;  %990 = vadd.xlane.f32.xlu1 %v989_v48 }
 0x541   :  { %v1493_v5 = vpop.eup %1492 }
 0x542   :  { %v738_v7 = vmul.f32 %v1493_v5, %v733_v61  ;;  %v1943_v8 = vpop.xlane.xlu0 %735  ;;  %v1945_v12 = vpop.eup %1494  ;;  %vm743_vm6 = vweird.f32 %v1493_v5 }
 0x543   :  { %1498 = vrcp.f32 %v1943_v8  ;;  %v480_v19 = vmul.f32 %v1945_v12, %v1906_v21  ;;  %vm744_vm8 = vmor %vm742_vm7, %vm743_vm6  ;;  %vm485_vm14 = vweird.f32 %v1945_v12  ;;  %vm489_vm7 = vcmp.eq.f32.partialorder %v488_v63, 8.507059e+37 }
 0x544   :  { %v739_v13 = vsub.f32 1.0, %v738_v7  ;;  %vm486_vm3 = vmor %vm484_vm15, %vm485_vm14  ;;  %v763_v60 = vand.u32 2147483648, %v1943_v8  ;;  %v761_v62 = vand.u32 2147483647, %v1943_v8 }
 0x545   :  { %v1497_v14 = vpop.eup %1496  ;;  %v481_v26 = vsub.f32 1.0, %v480_v19 }
 0x546   :  { %v740_v15 = vmul.f32 %v1493_v5, %v739_v13  ;;  %1440 = vmatmul.msk.f32.vlgmr.msrb.gmra.mxu2 %vm159_vm1, %v1497_v14  ;;  %v992_v17 = vsel %vm159_vm1, %v1497_v14, 0.0  ;;  %v764_v1 = vor.u32 1.1754944e-38, %v763_v60  ;;  %vm762_vm11 = vcmp.eq.f32.partialorder %v761_v62, 8.507059e+37 }
 0x547   :  { %993 = vadd.xlane.f32.xlu1 %v992_v17  ;;  %v482_v34 = vmul.f32 %v1945_v12, %v481_v26 }
 0x548   :  { %v741_v20 = vadd.f32 %v1493_v5, %v740_v15 }
 0x549   :  { %v1499_v30 = vpop.eup %1498  ;;  %v483_v43 = vadd.f32 %v1945_v12, %v482_v34 }
 0x54a   :  { %v229_v23 = vpop.xlane.xlu0 %228  ;;  %v745_v24 = vsel %vm744_vm8, %v1493_v5, %v741_v20  ;;  %v753_v36 = vmul.f32 %v1499_v30, %v1943_v8  ;;  %vm758_vm8 = vweird.f32 %v1499_v30 }
 0x54b   :  { %1500 = vrcp.f32 %v229_v23  ;;  %v750_v29 = vsel %vm747_vm9, %v749_v22, %v745_v24  ;;  %v254_v49 = vand.u32 2147483647, %v229_v23  ;;  %vm250_vm4 = vweird.f32 %v229_v23 }
 0x54c   :  { %v813_v31 = vmul.f32 %v1928_v44, %v750_v29  ;;  %v754_v40 = vsub.f32 1.0, %v753_v36  ;;  %v256_v44 = vand.u32 2147483648, %v229_v23  ;;  %v487_v53 = vsel %vm486_vm3, %v1945_v12, %v483_v43  ;;  %v1087_v36 = vld [vmem:[%s2113_s7 + $0x8] sm:$0xff]  ;;  %v1467_v43 = vld [vmem:[%s2114_s8] ss:$0 sm:$0xff] }
 0x54d   :  { %vm255_vm6 = vcmp.eq.f32.partialorder %v254_v49, 8.507059e+37  ;;  %v492_v57 = vsel %vm489_vm7, %v491_v55, %v487_v53  ;;  %vm757_vm9 = vweird.f32 %v1943_v8  ;;  %v1089_v8 = vld [vmem:[%s2113_s7 + $0x18] sm:$0xff]  ;;  %vm1081_vm7 = vcmask 261312  }
 0x54e   :  { %817 = vrot.lane.b32.xlu2 %v813_v31, %s1542_s6  ;;  %v755_v50 = vmul.f32 %v1499_v30, %v754_v40  ;;  %v257_v56 = vor.u32 1.1754944e-38, %v256_v44  ;;  %v555_v61 = vmul.f32 %v1880_v54, %v492_v57  ;;  %vm759_vm10 = vmor %vm757_vm9, %vm758_vm8  ;;  %1112 = vmatpush.msra.mxu3 %v1089_v8  ;;  %v1545_v53 = vmov 32.0  }
 0x550   :  { %v756_v59 = vadd.f32 %v1499_v30, %v755_v50 }
 0x551   :  { %v1501_v37 = vpop.eup %1500 }
 0x552   :  { %v246_v38 = vmul.f32 %v1501_v37, %v229_v23  ;;  %vm251_vm2 = vweird.f32 %v1501_v37  ;;  %v760_v0 = vsel %vm759_vm10, %v1499_v30, %v756_v59 }
 0x553   :  { %vm252_vm5 = vmor %vm250_vm4, %vm251_vm2  ;;  %v765_v2 = vsel %vm762_vm11, %v764_v1, %v760_v0 }
 0x554   :  { %v247_v42 = vsub.f32 1.0, %v246_v38  ;;  %v814_v3 = vmul.f32 %v1925_v41, %v765_v2  ;;  %v1088_v41 = vld [vmem:[%s2113_s7 + $0x10] sm:$0xff] }
 0x555   :  { %1113 = vmatpush.msra.mxu3 %v1088_v41  ;;  %v1242_v41 = vld [vmem:[%s2117_s11 + $0x78] sm:$0xff] }
 0x556   :  { %v248_v47 = vmul.f32 %v1501_v37, %v247_v42  ;;  %561 = vrot.lane.b32.xlu2 %v556_v45, %s1543_s19  ;;  %1247 = vmatpush.msrb.mxu1 %v1242_v41 }
 0x557   :  { %1114 = vmatpush.msra.mxu3 %v1087_v36  ;;  %v1469_v36 = vld [vmem:[%s2120_s14] ss:$0 sm:$0xff] }
 0x558   :  { %v249_v51 = vadd.f32 %v1501_v37, %v248_v47 }
 0x55a   :  { %v253_v52 = vsel %vm252_vm5, %v1501_v37, %v249_v51  ;;  %v1086_v37 = vld [vmem:[%s2113_s7] sm:$0xff] }
 0x55b   :  { %v258_v58 = vsel %vm255_vm6, %v257_v56, %v253_v52  ;;  %vm823_vm6 = vcmask 195712   ;;  %1115 = vmatpush.msra.mxu3 %v1086_v37  ;;  %v1232_v37 = vld [vmem:[%s2117_s11 + $0x28] sm:$0xff] }
 0x55c   :  { %v307_v21 = vmul.f32 %v1814_v11, %v258_v58 }
 0x55e   :  { %309 = vst.msk [vmem:[#allocation2 + $0x8] sm:$0xff] %vm159_vm1, %v307_v21 }
 0x560   :  { %559 = vrot.lane.b32.xlu1 %v555_v61, %s1543_s19 }
 0x568   :  { %819 = vrot.lane.b32.xlu1 %v814_v3, %s1542_s6 }
 0x5a8   :  { %v818_v11 = vpop.permute.xlu2 %817 }
 0x5b0   :  { %v562_v48 = vpop.permute.xlu2 %561 }
 0x5b1   :  { %567 = vst.msk [vmem:[#allocation2 + $0x8] sm:$0xff] %vm565_vm12, %v562_v48  ;;  %v1190_v48 = vld [vmem:[%s2115_s9 + $0x10] sm:$0xff] }
 0x5b2   :  { %v991_v54 = vpop.xlane.xlu1 %990 }
 0x5b3   :  { %1502 = vrcp.f32 %v991_v54  ;;  %v1006_v12 = vand.u32 2147483648, %v991_v54  ;;  %v1004_v14 = vand.u32 2147483647, %v991_v54  ;;  %vm1000_vm13 = vweird.f32 %v991_v54 }
 0x5b5   :  { %v1007_v17 = vor.u32 1.1754944e-38, %v1006_v12  ;;  %vm1005_vm15 = vcmp.eq.f32.partialorder %v1004_v14, 8.507059e+37  ;;  %v1240_v12 = vld [vmem:[%s2117_s11 + $0x68] sm:$0xff] }
 0x5b9   :  { %v1503_v4 = vpop.eup %1502 }
 0x5ba   :  { %v996_v5 = vmul.f32 %v1503_v4, %v991_v54  ;;  %v994_v7 = vpop.xlane.xlu1 %993  ;;  %vm1001_vm1 = vweird.f32 %v1503_v4  ;;  %v1189_v54 = vld [vmem:[%s2115_s9 + $0x8] sm:$0xff] }
 0x5bb   :  { %1504 = vrcp.f32 %v994_v7  ;;  %vm1002_vm14 = vmor %vm1000_vm13, %vm1001_vm1  ;;  %v1045_v20 = vpop.f32.mrf.mxu1  ;;  %v1021_v24 = vand.u32 2147483648, %v994_v7  ;;  %v1019_v26 = vand.u32 2147483647, %v994_v7  ;;  %vm1015_vm3 = vweird.f32 %v994_v7 }
 0x5bc   :  { %v997_v10 = vsub.f32 1.0, %v996_v5  ;;  %1506 = vrcp.f32 %v1545_v53  ;;  %v1227_v53 = vld [vmem:[%s2117_s11] sm:$0xff] }
 0x5bd   :  { %v1022_v29 = vor.u32 1.1754944e-38, %v1021_v24  ;;  %vm1020_vm5 = vcmp.eq.f32.partialorder %v1019_v26, 8.507059e+37  ;;  %v1235_v24 = vld [vmem:[%s2117_s11 + $0x40] sm:$0xff] }
 0x5be   :  { %v998_v13 = vmul.f32 %v1503_v4, %v997_v10  ;;  %v1241_v10 = vld [vmem:[%s2117_s11 + $0x70] sm:$0xff] }
 0x5bf   :  { %1248 = vmatpush.msrb.mxu1 %v1241_v10 }
 0x5c0   :  { %v999_v15 = vadd.f32 %v1503_v4, %v998_v13 }
 0x5c1   :  { %v1505_v16 = vpop.eup %1504  ;;  %1249 = vmatpush.msrb.mxu1 %v1240_v12 }
 0x5c2   :  { %v1011_v46 = vmul.f32 %v1505_v16, %v994_v7  ;;  %v1003_v18 = vsel %vm1002_vm14, %v1503_v4, %v999_v15  ;;  %vm1016_vm2 = vweird.f32 %v1505_v16  ;;  %v1507_v55 = vpop.eup %1506  ;;  %v1188_v4 = vld [vmem:[%s2115_s9] sm:$0xff] }
 0x5c3   :  { %v1008_v19 = vsel %vm1005_vm15, %v1007_v17, %v1003_v18  ;;  %vm1017_vm4 = vmor %vm1015_vm3, %vm1016_vm2  ;;  %v1132_v56 = vmul.f32 32.0, %v1507_v55  ;;  %vm1136_vm8 = vweird.f32 %v1507_v55  ;;  %v1239_v15 = vld [vmem:[%s2117_s11 + $0x60] sm:$0xff] }
 0x5c4   :  { %v1012_v22 = vsub.f32 1.0, %v1011_v46  ;;  %v1071_v23 = vmul.f32 %v1045_v20, %v1008_v19  ;;  %v1238_v46 = vld [vmem:[%s2117_s11 + $0x58] sm:$0xff]  ;;  %1250 = vmatpush.msrb.mxu1 %v1239_v15  ;;  %v1237_v19 = vld [vmem:[%s2117_s11 + $0x50] sm:$0xff] }
 0x5c5   :  { %v1133_v52 = vsub.f32 1.0, %v1132_v56 }
 0x5c6   :  { %1075 = vrot.lane.b32.xlu0 %v1071_v23, %s1544_s21  ;;  %v1013_v25 = vmul.f32 %v1505_v16, %v1012_v22  ;;  %1251 = vmatpush.msrb.mxu1 %v1238_v46  ;;  %v1236_v22 = vld [vmem:[%s2117_s11 + $0x48] sm:$0xff] }
 0x5c7   :  { %v1134_v57 = vmul.f32 %v1507_v55, %v1133_v52 }
 0x5c8   :  { %v1014_v28 = vadd.f32 %v1505_v16, %v1013_v25  ;;  %1252 = vmatpush.msrb.mxu1 %v1237_v19 }
 0x5c9   :  { %v1068_v32 = vpop.f32.mrf.mxu2  ;;  %v1135_v58 = vadd.f32 %v1507_v55, %v1134_v57 }
 0x5ca   :  { %v1018_v30 = vsel %vm1017_vm4, %v1505_v16, %v1014_v28  ;;  %1253 = vmatpush.msrb.mxu1 %v1236_v22  ;;  %v1234_v28 = vld [vmem:[%s2117_s11 + $0x38] sm:$0xff] }
 0x5cb   :  { %v1023_v31 = vsel %vm1020_vm5, %v1022_v29, %v1018_v30  ;;  %v1999_v59 = vsel %vm1136_vm8, %v1507_v55, %v1135_v58  ;;  %v1470_v55 = vld [vmem:[%s2116_s10] ss:$0 sm:$0xff] }
 0x5cc   :  { %v1072_v33 = vmul.f32 %v1068_v32, %v1023_v31  ;;  %1254 = vmatpush.msrb.mxu1 %v1235_v24  ;;  %v1468_v31 = vld [vmem:[%s2119_s13] ss:$0 sm:$0xff]  ;;  %v1233_v32 = vld [vmem:[%s2117_s11 + $0x30] sm:$0xff] }
 0x5ce   :  { %1077 = vrot.lane.b32.xlu0 %v1072_v33, %s1544_s21  ;;  %1255 = vmatpush.msrb.mxu1 %v1234_v28 }
 0x5d0   :  { %1256 = vmatpush.msrb.mxu1 %v1233_v32  ;;  %v1473_v32 = vld [vmem:[%s2122_s16] ss:$0 sm:$0xff]  ;;  %s1547_s16 = smov 128  }
 0x5d2   :  { %v560_v34 = vpop.permute.xlu1 %559  ;;  %1257 = vmatpush.msrb.mxu1 %v1232_v37 }
 0x5d3   :  { %566 = vst.msk [vmem:[#allocation2] sm:$0xff] %vm565_vm12, %v560_v34 }
 0x5d4   :  { %824 = vst.msk [vmem:[#allocation2] sm:$0xff] %vm823_vm6, %v818_v11  ;;  %v1191_v11 = vld [vmem:[%s2115_s9 + $0x18] sm:$0xff] }
 0x5d5   :  { %1214 = vmatpush.msra.mxu0 %v1191_v11 }
 0x5d7   :  { %1215 = vmatpush.msra.mxu0 %v1190_v48 }
 0x5d9   :  { %1216 = vmatpush.msra.mxu0 %v1189_v54 }
 0x5da   :  { %v820_v35 = vpop.permute.xlu1 %819 }
 0x5db   :  { %825 = vst.msk [vmem:[#allocation2 + $0x8] sm:$0xff] %vm823_vm6, %v820_v35  ;;  %1217 = vmatpush.msra.mxu0 %v1188_v4 }
 0x638   :  { %v1076_v38 = vpop.permute.xlu0 %1075 }
 0x639   :  { %1082 = vst.msk [vmem:[#allocation2] sm:$0xff] %vm1081_vm7, %v1076_v38 }
 0x640   :  { %v1078_v39 = vpop.permute.xlu0 %1077  ;;  %v1084_v40 = vld [vmem:[#allocation2] sm:$0xff] }
 0x641   :  { %1083 = vst.msk [vmem:[#allocation2 + $0x8] sm:$0xff] %vm1081_vm7, %v1078_v39  ;;  %1441 = vmatmul.msk.f32.vlgmr.msra.gmra.mxu3 %vm67_vm0, %v1084_v40  ;;  %v1231_v40 = vld [vmem:[%s2117_s11 + $0x20] sm:$0xff] }
 0x642   :  { %1258 = vmatpush.msrb.mxu1 %v1231_v40 }
 0x648   :  { %v1085_v42 = vld [vmem:[#allocation2 + $0x8] sm:$0xff] }
 0x649   :  { %1442 = vmatmul.msk.f32.gmra.mxu3 %vm67_vm0, %v1085_v42 }
 0x6c4   :  { %v1117_v27 = vpop.f32.mrf.mxu3 }
 0x6c5   :  { %v1118_v44 = vadd.f32 %v1467_v43, %v1117_v27  ;;  %v1230_v27 = vld [vmem:[%s2117_s11 + $0x18] sm:$0xff] }
 0x6c6   :  { %1259 = vmatpush.msrb.mxu1 %v1230_v27 }
 0x6c7   :  { %v1123_v45 = vadd.f32 %v1118_v44, %v1659_v6 }
 0x6c9   :  { %v1125_v47 = vsel %vm67_vm0, %v1123_v45, 0.0 }
 0x6ca   :  { %1126 = vadd.xlane.f32.xlu2 %v1125_v47 }
 0x6cc   :  { %v1120_v49 = vpop.f32.mrf.mxu3 }
 0x6cd   :  { %v1121_v63 = vadd.f32 %v1467_v43, %v1120_v49 }
 0x6cf   :  { %v1124_v50 = vadd.f32 %v1121_v63, %v1674_v9 }
 0x6d1   :  { %v1128_v51 = vsel %vm67_vm0, %v1124_v50, 0.0 }
 0x6d2   :  { %1129 = vadd.xlane.f32.xlu1 %v1128_v51  ;;  %v1228_v51 = vld [vmem:[%s2117_s11 + $0x8] sm:$0xff] }
 0x73d   :  { %v1127_v6 = vpop.xlane.xlu2 %1126 }
 0x73e   :  { %v1138_v21 = vmul.f32 %v1999_v59, %v1127_v6 }
 0x740   :  { %v1140_v60 = vsub.f32 %v1123_v45, %v1138_v21 }
 0x742   :  { %v1142_v61 = vmul.f32 %v1140_v60, %v1140_v60 }
 0x744   :  { %v1144_v9 = vsel %vm67_vm0, %v1142_v61, 0.0 }
 0x745   :  { %1145 = vadd.xlane.f32.xlu0 %v1144_v9  ;;  %v1130_v62 = vpop.xlane.xlu1 %1129 }
 0x746   :  { %v1139_v0 = vmul.f32 %v1999_v59, %v1130_v62 }
 0x748   :  { %v2004_v1 = vsub.f32 %v1124_v50, %v1139_v0  ;;  %v1229_v50 = vld [vmem:[%s2117_s11 + $0x10] sm:$0xff] }
 0x749   :  { %1260 = vmatpush.msrb.mxu1 %v1229_v50 }
 0x74a   :  { %v1143_v2 = vmul.f32 %v2004_v1, %v2004_v1 }
 0x74b   :  { %1261 = vmatpush.msrb.mxu1 %v1228_v51 }
 0x74c   :  { %v1147_v3 = vsel %vm67_vm0, %v1143_v2, 0.0 }
 0x74d   :  { %1148 = vadd.xlane.f32.xlu2 %v1147_v3  ;;  %1262 = vmatpush.msrb.mxu1 %v1227_v53 }
 0x7b8   :  { %v1146_v5 = vpop.xlane.xlu0 %1145 }
 0x7b9   :  { %v1150_v7 = vmul.f32 %v1146_v5, %v1999_v59 }
 0x7bb   :  { %v1152_v8 = vadd.f32 1e-05, %v1150_v7 }
 0x7bd   :  { %1508 = vrsqrt.f32 %v1152_v8  ;;  %vm1160_vm10 = vweird.f32 %v1152_v8 }
 0x7c0   :  { %v1149_v13 = vpop.xlane.xlu2 %1148 }
 0x7c1   :  { %v1151_v14 = vmul.f32 %v1149_v13, %v1999_v59 }
 0x7c3   :  { %v1509_v16 = vpop.eup %1508  ;;  %v1153_v17 = vadd.f32 1e-05, %v1151_v14 }
 0x7c4   :  { %v1155_v18 = vmul.f32 %v1509_v16, %v1152_v8  ;;  %vm1161_vm9 = vweird.f32 %v1509_v16 }
 0x7c5   :  { %1510 = vrsqrt.f32 %v1153_v17  ;;  %vm1162_vm11 = vmor %vm1160_vm10, %vm1161_vm9  ;;  %vm1170_vm1 = vweird.f32 %v1153_v17 }
 0x7c6   :  { %v1156_v20 = vmul.f32 %v1509_v16, %v1155_v18 }
 0x7c8   :  { %v1157_v23 = vmul.f32 0.5, %v1156_v20 }
 0x7ca   :  { %v1158_v25 = vsub.f32 1.5, %v1157_v23 }
 0x7cb   :  { %v1511_v26 = vpop.eup %1510 }
 0x7cc   :  { %v1159_v29 = vmul.f32 %v1509_v16, %v1158_v25  ;;  %v1165_v30 = vmul.f32 %v1511_v26, %v1153_v17  ;;  %vm1171_vm12 = vweird.f32 %v1511_v26 }
 0x7cd   :  { %vm1172_vm13 = vmor %vm1170_vm1, %vm1171_vm12 }
 0x7ce   :  { %v1163_v33 = vsel %vm1162_vm11, %v1509_v16, %v1159_v29  ;;  %v1166_v34 = vmul.f32 %v1511_v26, %v1165_v30  ;;  %v1472_v29 = vld [vmem:[%s2121_s15] ss:$0 sm:$0xff]  ;;  %s1546_s15 = smov [#allocation3]  }
 0x7cf   :  { %v1174_v35 = vmul.f32 %v1163_v33, %v1140_v60  ;;  %v1471_v60 = vld [vmem:[%s2118_s12] ss:$0 sm:$0xff]  ;;  %s1334_s28 = sshll.u32 %s1546_s15, 4  ;;  %s1335_s28 = int_to_ptr.vmem [resolvable:$true] %s1334_s28 }
 0x7d0   :  { %v1167_v38 = vmul.f32 0.5, %v1166_v34 }
 0x7d1   :  { %v1180_v39 = vmul.f32 %v1468_v31, %v1174_v35 }
 0x7d2   :  { %v1168_v42 = vsub.f32 1.5, %v1167_v38 }
 0x7d3   :  { %v1186_v43 = vadd.f32 %v1469_v36, %v1180_v39 }
 0x7d4   :  { %v1169_v44 = vmul.f32 %v1511_v26, %v1168_v42 }
 0x7d5   :  { %1443 = vmatmul.msk.f32.vlgmr.msra.gmra.mxu0 %vm67_vm0, %v1186_v43 }
 0x7d6   :  { %v1173_v45 = vsel %vm1172_vm13, %v1511_v26, %v1169_v44 }
 0x7d7   :  { %v1175_v47 = vmul.f32 %v1173_v45, %v2004_v1 }
 0x7d9   :  { %v1181_v49 = vmul.f32 %v1468_v31, %v1175_v47 }
 0x7db   :  { %v1187_v63 = vadd.f32 %v1469_v36, %v1181_v49 }
 0x7dd   :  { %1444 = vmatmul.msk.f32.gmra.mxu0 %vm67_vm0, %v1187_v63 }
 0x852   :  { %v1219_v56 = vpop.f32.mrf.mxu0 }
 0x853   :  { %v1220_v52 = vadd.f32 %v1470_v55, %v1219_v56 }
 0x855   :  { %v1225_v57 = vmax.f32 %v1220_v52, 0.0 }
 0x857   :  { %1263 = vmatmul.f32.vlgmr.msrb.gmra.mxu1 %v1225_v57 }
 0x85a   :  { %v1222_v58 = vpop.f32.mrf.mxu0 }
 0x85b   :  { %v1223_v6 = vadd.f32 %v1470_v55, %v1222_v58 }
 0x85d   :  { %v1226_v21 = vmax.f32 %v1223_v6, 0.0 }
 0x85f   :  { %1266 = vmatmul.f32.gmra.mxu1 %v1226_v21 }
 0x8d4   :  { %v1264_v61 = vpop.f32.mrf.mxu1 }
 0x8d5   :  { %v1265_v9 = vadd.f32 %v1471_v60, %v1264_v61 }
 0x8d7   :  { %v1270_v62 = vadd.f32 %v1265_v9, %v1186_v43 }
 0x8d9   :  { %v1272_v0 = vsel %vm67_vm0, %v1270_v62, 0.0 }
 0x8da   :  { %1273 = vadd.xlane.f32.xlu1 %v1272_v0 }
 0x8dc   :  { %v1267_v1 = vpop.f32.mrf.mxu1 }
 0x8dd   :  { %v1268_v2 = vadd.f32 %v1471_v60, %v1267_v1 }
 0x8df   :  { %v1271_v3 = vadd.f32 %v1268_v2, %v1187_v63 }
 0x8e1   :  { %v1275_v11 = vsel %vm67_vm0, %v1271_v3, 0.0 }
 0x8e2   :  { %1276 = vadd.xlane.f32.xlu0 %v1275_v11 }
 0x94d   :  { %v1274_v48 = vpop.xlane.xlu1 %1273 }
 0x94e   :  { %v1278_v54 = vmul.f32 %v1274_v48, %v1999_v59 }
 0x950   :  { %v1280_v4 = vsub.f32 %v1270_v62, %v1278_v54 }
 0x952   :  { %v1282_v5 = vmul.f32 %v1280_v4, %v1280_v4 }
 0x954   :  { %v1284_v7 = vsel %vm67_vm0, %v1282_v5, 0.0 }
 0x955   :  { %v1277_v8 = vpop.xlane.xlu0 %1276  ;;  %1285 = vadd.xlane.f32.xlu2 %v1284_v7 }
 0x956   :  { %v1279_v41 = vmul.f32 %v1277_v8, %v1999_v59 }
 0x958   :  { %v1281_v10 = vsub.f32 %v1271_v3, %v1279_v41 }
 0x95a   :  { %v1283_v12 = vmul.f32 %v1281_v10, %v1281_v10 }
 0x95c   :  { %v1287_v13 = vsel %vm67_vm0, %v1283_v12, 0.0 }
 0x95d   :  { %1288 = vadd.xlane.f32.xlu1 %v1287_v13 }
 0x9c8   :  { %v1286_v14 = vpop.xlane.xlu2 %1285 }
 0x9c9   :  { %v1290_v15 = vmul.f32 %v1286_v14, %v1999_v59 }
 0x9cb   :  { %v1292_v16 = vadd.f32 1e-05, %v1290_v15 }
 0x9cd   :  { %1512 = vrsqrt.f32 %v1292_v16  ;;  %vm1300_vm15 = vweird.f32 %v1292_v16 }
 0x9d0   :  { %v1289_v17 = vpop.xlane.xlu1 %1288 }
 0x9d1   :  { %v1291_v46 = vmul.f32 %v1289_v17, %v1999_v59 }
 0x9d3   :  { %v1513_v18 = vpop.eup %1512  ;;  %v1293_v19 = vadd.f32 1e-05, %v1291_v46 }
 0x9d4   :  { %v1295_v20 = vmul.f32 %v1513_v18, %v1292_v16  ;;  %vm1301_vm14 = vweird.f32 %v1513_v18 }
 0x9d5   :  { %1514 = vrsqrt.f32 %v1293_v19  ;;  %vm1302_vm2 = vmor %vm1300_vm15, %vm1301_vm14  ;;  %vm1310_vm4 = vweird.f32 %v1293_v19 }
 0x9d6   :  { %v1296_v22 = vmul.f32 %v1513_v18, %v1295_v20 }
 0x9d8   :  { %v1297_v23 = vmul.f32 0.5, %v1296_v22 }
 0x9da   :  { %v1298_v24 = vsub.f32 1.5, %v1297_v23 }
 0x9db   :  { %v1515_v25 = vpop.eup %1514 }
 0x9dc   :  { %v1299_v26 = vmul.f32 %v1513_v18, %v1298_v24  ;;  %v1305_v28 = vmul.f32 %v1515_v25, %v1293_v19  ;;  %vm1311_vm3 = vweird.f32 %v1515_v25 }
 0x9dd   :  { %vm1312_vm5 = vmor %vm1310_vm4, %vm1311_vm3 }
 0x9de   :  { %v1303_v30 = vsel %vm1302_vm2, %v1513_v18, %v1299_v26  ;;  %v1306_v31 = vmul.f32 %v1515_v25, %v1305_v28 }
 0x9df   :  { %v1314_v59 = vmul.f32 %v1303_v30, %v1280_v4 }
 0x9e0   :  { %v1307_v33 = vmul.f32 0.5, %v1306_v31 }
 0x9e1   :  { %v1320_v34 = vmul.f32 %v1472_v29, %v1314_v59 }
 0x9e2   :  { %v1308_v35 = vsub.f32 1.5, %v1307_v33 }
 0x9e3   :  { %v1326_v36 = vadd.f32 %v1473_v32, %v1320_v34 }
 0x9e4   :  { %v1309_v37 = vmul.f32 %v1515_v25, %v1308_v35 }
 0x9e5   :  { %1328 = vst.msk [vmem:[#allocation3] sm:$0xff] %vm67_vm0, %v1326_v36 }
 0x9e6   :  { %v1313_v38 = vsel %vm1312_vm5, %v1515_v25, %v1309_v37 }
 0x9e7   :  { %v1315_v39 = vmul.f32 %v1313_v38, %v1281_v10 }
 0x9e9   :  { %v1321_v40 = vmul.f32 %v1472_v29, %v1315_v39 }
 0x9eb   :  { %v1327_v42 = vadd.f32 %v1473_v32, %v1321_v40 }
 0x9ed   :  { %1329 = vst.msk [vmem:[#allocation3 + $0x8] sm:$0xff] %vm67_vm0, %v1327_v42 }
 0x9ee   :  { %1342 = dma.vmem_to_hbm [thread:$0]  %s1335_s28, 256, %s1337_s30, [#allocation4], %s1547_s16, %s1547_s16, %s1543_s19  }
 0x9ef   :  { %1540 = dma.done.wait [#allocation4], 256  }
 0x9f0   :  { %1541 = vsyncadd [#allocation4], 4294967040 }
 0x9f1   :  { %1347 = vsyncpa [#allocation4], 1 }

</bundles_post_ra>
